<compile_context>
chip_gen: v5e
topology: v5e:2x2
jax: 0.10.0
libtpu: 0.0.40
codegen_flags: <defaults>
</compile_context>

<pallas_src>
import functools

import jax
import jax.numpy as jnp
from jax.experimental import pallas as pl
from jax.experimental.pallas import tpu as pltpu

EPS = 1e-5


def _round_up(x, m):
    return (x + m - 1) // m * m


def _pick_batch_tile(B, L, max_rows=2048):
    """Largest multiple-of-8 divisor of B keeping TB*L rows modest (always divides B)."""
    if B <= 8:
        return B
    cap = max(8, (max_rows // max(L, 1)) // 8 * 8)
    tb = 0
    for cand in range(8, min(B, cap) + 1, 8):
        if B % cand == 0:
            tb = cand
    return tb if tb else B


def _cnn1d_embedder_kernel(xp_ref, w1_ref, w2_ref, vec_ref, pooled_ref, stats_ref,
                           y1p_ref, *, TB, L, K, E, pad, n_rows):
    phase = pl.program_id(0)        # 0: BN1-statistics pass, 1: normalize + conv2 pass
    tile = pl.program_id(1)         # batch-tile index

    vec = vec_ref[...]              # (8, E) packed per-channel vectors
    b1, g1, be1, b2 = vec[0:1], vec[1:2], vec[2:3], vec[3:4]

    # ---- one-time init: stat accumulators + y1 halo slabs (scratch persists) ------
    @pl.when(jnp.logical_and(phase == 0, tile == 0))
    def _init():
        stats_ref[...] = jnp.zeros_like(stats_ref)
        y1p_ref[:, :pad, :] = jnp.zeros((TB, pad, E), jnp.bfloat16)
        y1p_ref[:, pad + L:, :] = jnp.zeros((TB, pad, E), jnp.bfloat16)

    # ---- layer 1: Conv1d(1 -> E, k=K) as K VPU broadcast-FMAs (keeps the MXU free
    #      for the layer-2 matmul); shared by both passes ---------------------------
    xp = xp_ref[...]                                       # (TB, Lp, 1) f32
    w1 = w1_ref[...]                                       # (K, E)      f32
    h1 = xp[:, 0:L, :] * w1[0:1, :].reshape(1, 1, E)
    for k in range(1, K):
        h1 = h1 + xp[:, k:k + L, :] * w1[k:k + 1, :].reshape(1, 1, E)
    h1 = jnp.maximum(h1 + b1.reshape(1, 1, E), 0.0)        # (TB, L, E)
    h1_2d = h1.reshape(TB * L, E)

    # ---- pass 0: accumulate BN1 batch statistics (single-pass sum / sum-of-sq) ----
    @pl.when(phase == 0)
    def _pass0():
        stats_ref[0:1, :] = stats_ref[0:1, :] + jnp.sum(h1_2d, axis=0, keepdims=True)
        stats_ref[1:2, :] = stats_ref[1:2, :] + jnp.sum(h1_2d * h1_2d, axis=0,
                                                        keepdims=True)

    # ---- pass 1: BN1-normalize, conv2 as one bf16 MXU matmul, BN2 stats + pooling --
    @pl.when(phase == 1)
    def _pass1():
        @pl.when(tile == 0)
        def _finalize_bn1():
            m1 = stats_ref[0:1, :] * (1.0 / n_rows)
            v1 = jnp.maximum(stats_ref[1:2, :] * (1.0 / n_rows) - m1 * m1, 0.0)
            stats_ref[2:3, :] = m1
            stats_ref[3:4, :] = g1 * jax.lax.rsqrt(v1 + EPS)

        m1 = stats_ref[2:3, :]
        scale1 = stats_ref[3:4, :]
        y1 = (h1_2d - m1) * scale1 + be1                   # (TB*L, E) f32

        # Stage y1 once as bf16 (halo slabs already zero); it is re-read ~K times
        # below when building the conv2 windows.
        y1p_ref[:, pad:pad + L, :] = y1.reshape(TB, L, E).astype(jnp.bfloat16)

        # conv2: all K taps fused into ONE (TB*L, K*E) @ (K*E, E) bf16 matmul
        # (contraction K*E = 224 fills the MXU far better than K depth-E passes).
        win = jnp.concatenate([y1p_ref[:, k:k + L, :] for k in range(K)], axis=-1)
        win = win.reshape(TB * L, K * E)
        h2 = jnp.dot(win, w2_ref[...], preferred_element_type=jnp.float32)
        h2 = jnp.maximum(h2 + b2, 0.0)                     # (TB*L, E)

        stats_ref[4:5, :] = stats_ref[4:5, :] + jnp.sum(h2, axis=0, keepdims=True)
        stats_ref[5:6, :] = stats_ref[5:6, :] + jnp.sum(h2 * h2, axis=0,
                                                        keepdims=True)
        # AdaptiveAvgPool1d(1): mean over L.  BN2 is a per-channel affine, so its
        # normalization of the pooled value is applied in the wrapper once the
        # batch statistics (rows 4/5) are complete.
        pooled_ref[...] = jnp.mean(h2.reshape(TB, L, E), axis=1)


def cnn1d_token_embedder(x, params):
    """x: (B, L) float32 -> (B, embed_dim) float32 (training-mode BatchNorm)."""
    B, L = x.shape
    K, E = params["w1"].shape
    pad = K // 2
    # TODO(synk): even kernel_size with padding=K//2 changes L_out in PyTorch (L+1);
    # only the module's odd default (7) is supported here.
    assert K % 2 == 1, "kernel_size must be odd"
    Lp = L + 2 * pad

    TB = _pick_batch_tile(B, L)
    NB = B // TB
    n_rows = float(B * L)

    # Kernel input is just the zero-padded 1-channel signal (no host-side im2col).
    # The trailing singleton channel dim keeps the lane->sublane relayout out of the
    # kernel and only costs a small lane-sparse input tile in VMEM.
    xp = jnp.pad(x.astype(jnp.float32), ((0, 0), (pad, pad)))[:, :, None]

    # Pack the four per-channel vectors the kernel needs into one (8, E) array.
    vec = jnp.concatenate(
        [params["b1"], params["g1"], params["be1"], params["b2"],
         jnp.zeros((4, E), jnp.float32)], axis=0)

    w2_bf16 = params["w2"].astype(jnp.bfloat16)            # (K*E, E) bf16 MXU operand

    # VMEM budget derived from the actual (double-buffered) tiles, not a blanket cap.
    e_pad = _round_up(E, 128)
    rows = TB * L
    in_tile = TB * _round_up(Lp, 8) * 128 * 4
    weights = (_round_up(K, 8) * e_pad * 4 + _round_up(K * E, 16) * e_pad * 2
               + 8 * e_pad * 4)
    out_tiles = _round_up(TB, 8) * e_pad * 4 + 8 * e_pad * 4
    scratch = TB * _round_up(Lp, 16) * e_pad * 2
    interm = (3 * _round_up(rows, 8) * e_pad * 4
              + _round_up(rows, 16) * _round_up(K * E, 128) * 2)
    vmem_limit = int(min(48 * 1024 * 1024,
                         max(16 * 1024 * 1024,
                             2 * (in_tile + out_tiles) + weights + scratch
                             + 2 * interm)))

    cost = pl.CostEstimate(
        flops=2 * B * L * K * E * (E + 2),
        transcendentals=E,
        bytes_accessed=2 * B * Lp * 4 + K * E * 4 + K * E * E * 2 + (B + 8) * E * 4)

    kernel = functools.partial(_cnn1d_embedder_kernel, TB=TB, L=L, K=K, E=E,
                               pad=pad, n_rows=n_rows)

    pooled_raw, stats = pl.pallas_call(
        kernel,
        out_shape=(jax.ShapeDtypeStruct((B, E), jnp.float32),     # raw pooled means
                   jax.ShapeDtypeStruct((8, E), jnp.float32)),    # BN sums / stats
        grid=(2, NB),                                             # (phase, batch tile)
        in_specs=[
            pl.BlockSpec((TB, Lp, 1), lambda p, j: (j, 0, 0)),    # padded signal tile
            pl.BlockSpec((K, E), lambda p, j: (0, 0)),            # conv1 weight
            pl.BlockSpec((K * E, E), lambda p, j: (0, 0)),        # conv2 weight (bf16)
            pl.BlockSpec((8, E), lambda p, j: (0, 0)),            # packed vectors
        ],
        out_specs=(
            pl.BlockSpec((TB, E), lambda p, j: (j, 0)),           # per-tile pooled
            pl.BlockSpec((8, E), lambda p, j: (0, 0)),            # resident accumulator
        ),
        scratch_shapes=[pltpu.VMEM((TB, Lp, E), jnp.bfloat16)],   # bf16 y1 staging
        compiler_params=pltpu.CompilerParams(
            dimension_semantics=("arbitrary", "arbitrary"),
            vmem_limit_bytes=vmem_limit),
        cost_estimate=cost,
    )(xp, params["w1"], w2_bf16, vec)

    # Finalize BatchNorm #2 fused with AdaptiveAvgPool1d(1): BN is a per-channel
    # affine, so pool-then-normalize == normalize-then-pool.  Its batch statistics
    # couple every tile, hence this tiny (B, E) affine lives outside the grid.
    m2 = stats[4] / n_rows
    v2 = jnp.maximum(stats[5] / n_rows - m2 * m2, 0.0)
    scale2 = params["g2"][0] * jax.lax.rsqrt(v2 + EPS)
    return (pooled_raw - m2) * scale2 + params["be2"][0]


def reference_forward(x, params):
    """Pure-JAX f32 reference mirroring the PyTorch forward (training-mode BN)."""
    B, L = x.shape
    K, E = params["w1"].shape
    pad = K // 2
    xp = jnp.pad(x.astype(jnp.float32), ((0, 0), (pad, pad)))
    h = jnp.zeros((B, L, E), jnp.float32)
    for k in range(K):
        h = h + xp[:, k:k + L, None] * params["w1"][k][None, None, :]
    h = jax.nn.relu(h + params["b1"][None])
    m1 = h.mean((0, 1))
    v1 = ((h - m1) ** 2).mean((0, 1))
    h = params["g1"] * (h - m1) / jnp.sqrt(v1 + EPS) + params["be1"]

    w2 = params["w2"].reshape(K, E, E)            # [k, c_in, c_out]
    hp = jnp.pad(h, ((0, 0), (pad, pad), (0, 0)))
    h2 = jnp.zeros((B, L, E), jnp.float32)
    for k in range(K):
        h2 = h2 + jnp.einsum("bli,io->blo", hp[:, k:k + L, :], w2[k])
    h2 = jax.nn.relu(h2 + params["b2"][None])
    m2 = h2.mean((0, 1))
    v2 = ((h2 - m2) ** 2).mean((0, 1))
    h2 = params["g2"] * (h2 - m2) / jnp.sqrt(v2 + EPS) + params["be2"]
    return h2.mean(1)


def make_params(key, in_channels=1, embed_dim=32, kernel_size=7):
    K, E = kernel_size, embed_dim
    k1, k2, k3, k4 = jax.random.split(key, 4)
    bound1 = 1.0 / (in_channels * K) ** 0.5
    bound2 = 1.0 / (E * K) ** 0.5
    return {
        # conv1 weight stored as (K, E): w1[k, e] == torch_w1[e, 0, k]
        "w1": jax.random.uniform(k1, (K, E), jnp.float32, -bound1, bound1),
        "b1": jax.random.uniform(k2, (1, E), jnp.float32, -bound1, bound1),
        "g1": jnp.ones((1, E), jnp.float32),
        "be1": jnp.zeros((1, E), jnp.float32),
        # conv2 weight stored as (K*E, E): w2[k*E + i, o] == torch_w2[o, i, k]
        "w2": jax.random.uniform(k3, (K * E, E), jnp.float32, -bound2, bound2),
        "b2": jax.random.uniform(k4, (1, E), jnp.float32, -bound2, bound2),
        "g2": jnp.ones((1, E), jnp.float32),
        "be2": jnp.zeros((1, E), jnp.float32),
    }


if __name__ == "__main__":
    B, L, E, K = 4, 16, 32, 7
    key = jax.random.PRNGKey(0)
    kp, kx = jax.random.split(key)
    params = make_params(kp, in_channels=1, embed_dim=E, kernel_size=K)
    x = jax.random.normal(kx, (B, L), jnp.float32)

    out = jax.block_until_ready(cnn1d_token_embedder(x, params))
    ref = jax.block_until_ready(reference_forward(x, params))

    assert out.shape == (B, E), out.shape
    # Layer-2 operands (and the y1 staging scratch) are bf16 with f32 accumulation,
    # so compare at bf16-level tolerance against the pure-f32 reference.
    if not jnp.allclose(out, ref, rtol=2e-2, atol=2e-2):
        raise AssertionError("Pallas kernel output mismatch vs reference")
    print("KERNEL_OK")
</pallas_src>

<mosaic_0001>
module attributes {stable_mosaic.version = 11 : i64} {
  func.func @_cnn1d_embedder_kernel(%arg0: i32, %arg1: i32, %arg2: memref<4x22x1xf32, #tpu.memory_space<vmem>>, %arg3: memref<7x32xf32, #tpu.memory_space<vmem>>, %arg4: memref<224x32xbf16, #tpu.memory_space<vmem>>, %arg5: memref<8x32xf32, #tpu.memory_space<vmem>>, %arg6: memref<4x32xf32, #tpu.memory_space<vmem>>, %arg7: memref<8x32xf32, #tpu.memory_space<vmem>>, %arg8: memref<4x22x32xbf16, #tpu.memory_space<vmem>>) attributes {dimension_semantics = [#tpu.dimension_semantics<arbitrary>, #tpu.dimension_semantics<arbitrary>], iteration_bounds = array<i64: 2, 1>, scalar_prefetch = 0 : i64, scratch_operands = 1 : i64, tpu.core_type = #tpu.core_type<tc>, window_params = [{transform_indices = @transform_0, window_bounds = array<i64: 4, 22, 1>}, {pipeline_mode = #tpu.pipeline_mode<synchronous>, transform_indices = @transform_1, window_bounds = array<i64: 7, 32>}, {pipeline_mode = #tpu.pipeline_mode<synchronous>, transform_indices = @transform_2, window_bounds = array<i64: 224, 32>}, {pipeline_mode = #tpu.pipeline_mode<synchronous>, transform_indices = @transform_3, window_bounds = array<i64: 8, 32>}, {transform_indices = @transform_4, window_bounds = array<i64: 4, 32>}, {pipeline_mode = #tpu.pipeline_mode<synchronous>, transform_indices = @transform_5, window_bounds = array<i64: 8, 32>}]} {
    %c0 = arith.constant 0 : index
    %c0_0 = arith.constant 0 : index
    %0 = vector.load %arg5[%c0, %c0_0] : memref<8x32xf32, #tpu.memory_space<vmem>>, vector<8x32xf32>
    %1 = vector.extract_strided_slice %0 {offsets = [0, 0], sizes = [1, 32], strides = [1, 1]} : vector<8x32xf32> to vector<1x32xf32>
    %2 = vector.extract_strided_slice %0 {offsets = [1, 0], sizes = [1, 32], strides = [1, 1]} : vector<8x32xf32> to vector<1x32xf32>
    %3 = vector.extract_strided_slice %0 {offsets = [2, 0], sizes = [1, 32], strides = [1, 1]} : vector<8x32xf32> to vector<1x32xf32>
    %4 = vector.extract_strided_slice %0 {offsets = [3, 0], sizes = [1, 32], strides = [1, 1]} : vector<8x32xf32> to vector<1x32xf32>
    %c0_i32 = arith.constant 0 : i32
    %5 = arith.cmpi eq, %arg0, %c0_i32 : i32
    %c0_i32_1 = arith.constant 0 : i32
    %6 = arith.cmpi eq, %arg1, %c0_i32_1 : i32
    %7 = arith.andi %5, %6 : i1
    %8 = arith.extui %7 : i1 to i32
    %c0_i32_2 = arith.constant 0 : i32
    %9 = arith.cmpi ne, %8, %c0_i32_2 : i32
    scf.if %9 {
      %cst_11 = arith.constant 0.000000e+00 : f32
      %72 = vector.broadcast %cst_11 : f32 to vector<8x32xf32>
      %c0_12 = arith.constant 0 : index
      %c0_13 = arith.constant 0 : index
      %73 = vector.load %arg7[%c0_12, %c0_13] : memref<8x32xf32, #tpu.memory_space<vmem>>, vector<8x32xf32>
      tpu.vector_store %arg7[%c0_12, %c0_13], %72 {strides = array<i32>} : memref<8x32xf32, #tpu.memory_space<vmem>>, vector<8x32xf32>,
      %cst_14 = arith.constant 0.000000e+00 : bf16
      %74 = vector.broadcast %cst_14 : bf16 to vector<4x3x32xbf16>
      %c0_15 = arith.constant 0 : index
      %c0_16 = arith.constant 0 : index
      %c0_17 = arith.constant 0 : index
      %75 = vector.load %arg8[%c0_15, %c0_16, %c0_17] : memref<4x22x32xbf16, #tpu.memory_space<vmem>>, vector<4x3x32xbf16>
      tpu.vector_store %arg8[%c0_15, %c0_16, %c0_17], %74 {strides = array<i32>} : memref<4x22x32xbf16, #tpu.memory_space<vmem>>, vector<4x3x32xbf16>,
      %cst_18 = arith.constant 0.000000e+00 : bf16
      %76 = vector.broadcast %cst_18 : bf16 to vector<4x3x32xbf16>
      %c0_19 = arith.constant 0 : index
      %c19 = arith.constant 19 : index
      %c0_20 = arith.constant 0 : index
      %77 = vector.load %arg8[%c0_19, %c19, %c0_20] : memref<4x22x32xbf16, #tpu.memory_space<vmem>>, vector<4x3x32xbf16>
      tpu.vector_store %arg8[%c0_19, %c19, %c0_20], %76 {strides = array<i32>} : memref<4x22x32xbf16, #tpu.memory_space<vmem>>, vector<4x3x32xbf16>,
    } else {
    }
    %c0_3 = arith.constant 0 : index
    %c0_4 = arith.constant 0 : index
    %c0_5 = arith.constant 0 : index
    %10 = vector.load %arg2[%c0_3, %c0_4, %c0_5] : memref<4x22x1xf32, #tpu.memory_space<vmem>>, vector<4x22x1xf32>
    %c0_6 = arith.constant 0 : index
    %c0_7 = arith.constant 0 : index
    %11 = vector.load %arg3[%c0_6, %c0_7] : memref<7x32xf32, #tpu.memory_space<vmem>>, vector<7x32xf32>
    %12 = vector.extract_strided_slice %10 {offsets = [0, 0, 0], sizes = [4, 16, 1], strides = [1, 1, 1]} : vector<4x22x1xf32> to vector<4x16x1xf32>
    %13 = vector.extract_strided_slice %11 {offsets = [0, 0], sizes = [1, 32], strides = [1, 1]} : vector<7x32xf32> to vector<1x32xf32>
    %14 = vector.shape_cast %13 : vector<1x32xf32> to vector<1x1x32xf32>
    %15 = vector.broadcast %12 : vector<4x16x1xf32> to vector<4x16x32xf32>
    %16 = vector.broadcast %14 : vector<1x1x32xf32> to vector<4x16x32xf32>
    %17 = arith.mulf %15, %16 : vector<4x16x32xf32>
    %18 = vector.extract_strided_slice %10 {offsets = [0, 1, 0], sizes = [4, 16, 1], strides = [1, 1, 1]} : vector<4x22x1xf32> to vector<4x16x1xf32>
    %19 = vector.extract_strided_slice %11 {offsets = [1, 0], sizes = [1, 32], strides = [1, 1]} : vector<7x32xf32> to vector<1x32xf32>
    %20 = vector.shape_cast %19 : vector<1x32xf32> to vector<1x1x32xf32>
    %21 = vector.broadcast %18 : vector<4x16x1xf32> to vector<4x16x32xf32>
    %22 = vector.broadcast %20 : vector<1x1x32xf32> to vector<4x16x32xf32>
    %23 = arith.mulf %21, %22 : vector<4x16x32xf32>
    %24 = arith.addf %17, %23 : vector<4x16x32xf32>
    %25 = vector.extract_strided_slice %10 {offsets = [0, 2, 0], sizes = [4, 16, 1], strides = [1, 1, 1]} : vector<4x22x1xf32> to vector<4x16x1xf32>
    %26 = vector.extract_strided_slice %11 {offsets = [2, 0], sizes = [1, 32], strides = [1, 1]} : vector<7x32xf32> to vector<1x32xf32>
    %27 = vector.shape_cast %26 : vector<1x32xf32> to vector<1x1x32xf32>
    %28 = vector.broadcast %25 : vector<4x16x1xf32> to vector<4x16x32xf32>
    %29 = vector.broadcast %27 : vector<1x1x32xf32> to vector<4x16x32xf32>
    %30 = arith.mulf %28, %29 : vector<4x16x32xf32>
    %31 = arith.addf %24, %30 : vector<4x16x32xf32>
    %32 = vector.extract_strided_slice %10 {offsets = [0, 3, 0], sizes = [4, 16, 1], strides = [1, 1, 1]} : vector<4x22x1xf32> to vector<4x16x1xf32>
    %33 = vector.extract_strided_slice %11 {offsets = [3, 0], sizes = [1, 32], strides = [1, 1]} : vector<7x32xf32> to vector<1x32xf32>
    %34 = vector.shape_cast %33 : vector<1x32xf32> to vector<1x1x32xf32>
    %35 = vector.broadcast %32 : vector<4x16x1xf32> to vector<4x16x32xf32>
    %36 = vector.broadcast %34 : vector<1x1x32xf32> to vector<4x16x32xf32>
    %37 = arith.mulf %35, %36 : vector<4x16x32xf32>
    %38 = arith.addf %31, %37 : vector<4x16x32xf32>
    %39 = vector.extract_strided_slice %10 {offsets = [0, 4, 0], sizes = [4, 16, 1], strides = [1, 1, 1]} : vector<4x22x1xf32> to vector<4x16x1xf32>
    %40 = vector.extract_strided_slice %11 {offsets = [4, 0], sizes = [1, 32], strides = [1, 1]} : vector<7x32xf32> to vector<1x32xf32>
    %41 = vector.shape_cast %40 : vector<1x32xf32> to vector<1x1x32xf32>
    %42 = vector.broadcast %39 : vector<4x16x1xf32> to vector<4x16x32xf32>
    %43 = vector.broadcast %41 : vector<1x1x32xf32> to vector<4x16x32xf32>
    %44 = arith.mulf %42, %43 : vector<4x16x32xf32>
    %45 = arith.addf %38, %44 : vector<4x16x32xf32>
    %46 = vector.extract_strided_slice %10 {offsets = [0, 5, 0], sizes = [4, 16, 1], strides = [1, 1, 1]} : vector<4x22x1xf32> to vector<4x16x1xf32>
    %47 = vector.extract_strided_slice %11 {offsets = [5, 0], sizes = [1, 32], strides = [1, 1]} : vector<7x32xf32> to vector<1x32xf32>
    %48 = vector.shape_cast %47 : vector<1x32xf32> to vector<1x1x32xf32>
    %49 = vector.broadcast %46 : vector<4x16x1xf32> to vector<4x16x32xf32>
    %50 = vector.broadcast %48 : vector<1x1x32xf32> to vector<4x16x32xf32>
    %51 = arith.mulf %49, %50 : vector<4x16x32xf32>
    %52 = arith.addf %45, %51 : vector<4x16x32xf32>
    %53 = vector.extract_strided_slice %10 {offsets = [0, 6, 0], sizes = [4, 16, 1], strides = [1, 1, 1]} : vector<4x22x1xf32> to vector<4x16x1xf32>
    %54 = vector.extract_strided_slice %11 {offsets = [6, 0], sizes = [1, 32], strides = [1, 1]} : vector<7x32xf32> to vector<1x32xf32>
    %55 = vector.shape_cast %54 : vector<1x32xf32> to vector<1x1x32xf32>
    %56 = vector.broadcast %53 : vector<4x16x1xf32> to vector<4x16x32xf32>
    %57 = vector.broadcast %55 : vector<1x1x32xf32> to vector<4x16x32xf32>
    %58 = arith.mulf %56, %57 : vector<4x16x32xf32>
    %59 = arith.addf %52, %58 : vector<4x16x32xf32>
    %60 = vector.shape_cast %1 : vector<1x32xf32> to vector<1x1x32xf32>
    %61 = vector.broadcast %60 : vector<1x1x32xf32> to vector<4x16x32xf32>
    %62 = arith.addf %59, %61 : vector<4x16x32xf32>
    %cst = arith.constant 0.000000e+00 : f32
    %63 = vector.broadcast %cst : f32 to vector<4x16x32xf32>
    %64 = arith.maximumf %62, %63 : vector<4x16x32xf32>
    %65 = vector.shape_cast %64 : vector<4x16x32xf32> to vector<64x32xf32>
    %c0_i32_8 = arith.constant 0 : i32
    %66 = arith.cmpi eq, %arg0, %c0_i32_8 : i32
    %67 = arith.extui %66 : i1 to i32
    %c0_i32_9 = arith.constant 0 : i32
    %68 = arith.cmpi ne, %67, %c0_i32_9 : i32
    scf.if %68 {
      %c0_11 = arith.constant 0 : index
      %c0_12 = arith.constant 0 : index
      %72 = vector.load %arg7[%c0_11, %c0_12] : memref<8x32xf32, #tpu.memory_space<vmem>>, vector<1x32xf32>
      %cst_13 = arith.constant dense<0.000000e+00> : vector<32xf32>
      %73 = vector.multi_reduction <add>, %65, %cst_13 [0] : vector<64x32xf32> to vector<32xf32>
      %74 = vector.shape_cast %73 : vector<32xf32> to vector<1x32xf32>
      %75 = arith.addf %72, %74 : vector<1x32xf32>
      %c0_14 = arith.constant 0 : index
      %c0_15 = arith.constant 0 : index
      %76 = vector.load %arg7[%c0_14, %c0_15] : memref<8x32xf32, #tpu.memory_space<vmem>>, vector<1x32xf32>
      tpu.vector_store %arg7[%c0_14, %c0_15], %75 {strides = array<i32>} : memref<8x32xf32, #tpu.memory_space<vmem>>, vector<1x32xf32>,
      %c1 = arith.constant 1 : index
      %c0_16 = arith.constant 0 : index
      %77 = vector.load %arg7[%c1, %c0_16] : memref<8x32xf32, #tpu.memory_space<vmem>>, vector<1x32xf32>
      %78 = arith.mulf %65, %65 : vector<64x32xf32>
      %cst_17 = arith.constant dense<0.000000e+00> : vector<32xf32>
      %79 = vector.multi_reduction <add>, %78, %cst_17 [0] : vector<64x32xf32> to vector<32xf32>
      %80 = vector.shape_cast %79 : vector<32xf32> to vector<1x32xf32>
      %81 = arith.addf %77, %80 : vector<1x32xf32>
      %c1_18 = arith.constant 1 : index
      %c0_19 = arith.constant 0 : index
      %82 = vector.load %arg7[%c1_18, %c0_19] : memref<8x32xf32, #tpu.memory_space<vmem>>, vector<1x32xf32>
      tpu.vector_store %arg7[%c1_18, %c0_19], %81 {strides = array<i32>} : memref<8x32xf32, #tpu.memory_space<vmem>>, vector<1x32xf32>,
    } else {
    }
    %c1_i32 = arith.constant 1 : i32
    %69 = arith.cmpi eq, %arg0, %c1_i32 : i32
    %70 = arith.extui %69 : i1 to i32
    %c0_i32_10 = arith.constant 0 : i32
    %71 = arith.cmpi ne, %70, %c0_i32_10 : i32
    scf.if %71 {
      %c0_i32_11 = arith.constant 0 : i32
      %72 = arith.cmpi eq, %arg1, %c0_i32_11 : i32
      %73 = arith.extui %72 : i1 to i32
      %c0_i32_12 = arith.constant 0 : i32
      %74 = arith.cmpi ne, %73, %c0_i32_12 : i32
      scf.if %74 {
        %c0_53 = arith.constant 0 : index
        %c0_54 = arith.constant 0 : index
        %117 = vector.load %arg7[%c0_53, %c0_54] : memref<8x32xf32, #tpu.memory_space<vmem>>, vector<1x32xf32>
        %cst_55 = arith.constant 1.562500e-02 : f32
        %118 = vector.broadcast %cst_55 : f32 to vector<1x32xf32>
        %119 = arith.mulf %117, %118 : vector<1x32xf32>
        %c1_56 = arith.constant 1 : index
        %c0_57 = arith.constant 0 : index
        %120 = vector.load %arg7[%c1_56, %c0_57] : memref<8x32xf32, #tpu.memory_space<vmem>>, vector<1x32xf32>
        %cst_58 = arith.constant 1.562500e-02 : f32
        %121 = vector.broadcast %cst_58 : f32 to vector<1x32xf32>
        %122 = arith.mulf %120, %121 : vector<1x32xf32>
        %123 = arith.mulf %119, %119 : vector<1x32xf32>
        %124 = arith.subf %122, %123 : vector<1x32xf32>
        %cst_59 = arith.constant 0.000000e+00 : f32
        %125 = vector.broadcast %cst_59 : f32 to vector<1x32xf32>
        %126 = arith.maximumf %124, %125 : vector<1x32xf32>
        %c2_60 = arith.constant 2 : index
        %c0_61 = arith.constant 0 : index
        %127 = vector.load %arg7[%c2_60, %c0_61] : memref<8x32xf32, #tpu.memory_space<vmem>>, vector<1x32xf32>
        tpu.vector_store %arg7[%c2_60, %c0_61], %119 {strides = array<i32>} : memref<8x32xf32, #tpu.memory_space<vmem>>, vector<1x32xf32>,
        %cst_62 = arith.constant 9.99999974E-6 : f32
        %128 = vector.broadcast %cst_62 : f32 to vector<1x32xf32>
        %129 = arith.addf %126, %128 : vector<1x32xf32>
        %130 = math.rsqrt %129 : vector<1x32xf32>
        %131 = arith.mulf %2, %130 : vector<1x32xf32>
        %c3_63 = arith.constant 3 : index
        %c0_64 = arith.constant 0 : index
        %132 = vector.load %arg7[%c3_63, %c0_64] : memref<8x32xf32, #tpu.memory_space<vmem>>, vector<1x32xf32>
        tpu.vector_store %arg7[%c3_63, %c0_64], %131 {strides = array<i32>} : memref<8x32xf32, #tpu.memory_space<vmem>>, vector<1x32xf32>,
      } else {
      }
      %c2 = arith.constant 2 : index
      %c0_13 = arith.constant 0 : index
      %75 = vector.load %arg7[%c2, %c0_13] : memref<8x32xf32, #tpu.memory_space<vmem>>, vector<1x32xf32>
      %c3 = arith.constant 3 : index
      %c0_14 = arith.constant 0 : index
      %76 = vector.load %arg7[%c3, %c0_14] : memref<8x32xf32, #tpu.memory_space<vmem>>, vector<1x32xf32>
      %77 = vector.broadcast %75 : vector<1x32xf32> to vector<64x32xf32>
      %78 = arith.subf %65, %77 : vector<64x32xf32>
      %79 = vector.broadcast %76 : vector<1x32xf32> to vector<64x32xf32>
      %80 = arith.mulf %78, %79 : vector<64x32xf32>
      %81 = vector.broadcast %3 : vector<1x32xf32> to vector<64x32xf32>
      %82 = arith.addf %80, %81 : vector<64x32xf32>
      %83 = vector.shape_cast %82 : vector<64x32xf32> to vector<4x16x32xf32>
      %84 = arith.truncf %83 : vector<4x16x32xf32> to vector<4x16x32xbf16>
      %c0_15 = arith.constant 0 : index
      %c3_16 = arith.constant 3 : index
      %c0_17 = arith.constant 0 : index
      %85 = vector.load %arg8[%c0_15, %c3_16, %c0_17] : memref<4x22x32xbf16, #tpu.memory_space<vmem>>, vector<4x16x32xbf16>
      tpu.vector_store %arg8[%c0_15, %c3_16, %c0_17], %84 {strides = array<i32>} : memref<4x22x32xbf16, #tpu.memory_space<vmem>>, vector<4x16x32xbf16>,
      %c0_18 = arith.constant 0 : index
      %c0_19 = arith.constant 0 : index
      %c0_20 = arith.constant 0 : index
      %86 = vector.load %arg8[%c0_18, %c0_19, %c0_20] : memref<4x22x32xbf16, #tpu.memory_space<vmem>>, vector<4x16x32xbf16>
      %c0_21 = arith.constant 0 : index
      %c1 = arith.constant 1 : index
      %c0_22 = arith.constant 0 : index
      %87 = vector.load %arg8[%c0_21, %c1, %c0_22] : memref<4x22x32xbf16, #tpu.memory_space<vmem>>, vector<4x16x32xbf16>
      %c0_23 = arith.constant 0 : index
      %c2_24 = arith.constant 2 : index
      %c0_25 = arith.constant 0 : index
      %88 = vector.load %arg8[%c0_23, %c2_24, %c0_25] : memref<4x22x32xbf16, #tpu.memory_space<vmem>>, vector<4x16x32xbf16>
      %c0_26 = arith.constant 0 : index
      %c3_27 = arith.constant 3 : index
      %c0_28 = arith.constant 0 : index
      %89 = vector.load %arg8[%c0_26, %c3_27, %c0_28] : memref<4x22x32xbf16, #tpu.memory_space<vmem>>, vector<4x16x32xbf16>
      %c0_29 = arith.constant 0 : index
      %c4 = arith.constant 4 : index
      %c0_30 = arith.constant 0 : index
      %90 = vector.load %arg8[%c0_29, %c4, %c0_30] : memref<4x22x32xbf16, #tpu.memory_space<vmem>>, vector<4x16x32xbf16>
      %c0_31 = arith.constant 0 : index
      %c5 = arith.constant 5 : index
      %c0_32 = arith.constant 0 : index
      %91 = vector.load %arg8[%c0_31, %c5, %c0_32] : memref<4x22x32xbf16, #tpu.memory_space<vmem>>, vector<4x16x32xbf16>
      %c0_33 = arith.constant 0 : index
      %c6 = arith.constant 6 : index
      %c0_34 = arith.constant 0 : index
      %92 = vector.load %arg8[%c0_33, %c6, %c0_34] : memref<4x22x32xbf16, #tpu.memory_space<vmem>>, vector<4x16x32xbf16>
      %93 = tpu.concatenate %86, %87, %88, %89, %90, %91, %92 in 2 : vector<4x16x32xbf16>, vector<4x16x32xbf16>, vector<4x16x32xbf16>, vector<4x16x32xbf16>, vector<4x16x32xbf16>, vector<4x16x32xbf16>, vector<4x16x32xbf16> -> vector<4x16x224xbf16>
      %94 = vector.shape_cast %93 : vector<4x16x224xbf16> to vector<64x224xbf16>
      %c0_35 = arith.constant 0 : index
      %c0_36 = arith.constant 0 : index
      %95 = vector.load %arg4[%c0_35, %c0_36] : memref<224x32xbf16, #tpu.memory_space<vmem>>, vector<224x32xbf16>
      %cst_37 = arith.constant dense<0.000000e+00> : vector<64x32xf32>
      %96 = tpu.matmul %94, %95, %cst_37 {dimension_numbers = #tpu.dot_dimension_numbers<[1], [0], [0], [1], [0, 0, 1, 1], [], []>} : vector<64x224xbf16>, vector<224x32xbf16>, vector<64x32xf32> -> vector<64x32xf32>
      %97 = vector.broadcast %4 : vector<1x32xf32> to vector<64x32xf32>
      %98 = arith.addf %96, %97 : vector<64x32xf32>
      %cst_38 = arith.constant 0.000000e+00 : f32
      %99 = vector.broadcast %cst_38 : f32 to vector<64x32xf32>
      %100 = arith.maximumf %98, %99 : vector<64x32xf32>
      %c4_39 = arith.constant 4 : index
      %c0_40 = arith.constant 0 : index
      %101 = vector.load %arg7[%c4_39, %c0_40] : memref<8x32xf32, #tpu.memory_space<vmem>>, vector<1x32xf32>
      %cst_41 = arith.constant dense<0.000000e+00> : vector<32xf32>
      %102 = vector.multi_reduction <add>, %100, %cst_41 [0] : vector<64x32xf32> to vector<32xf32>
      %103 = vector.shape_cast %102 : vector<32xf32> to vector<1x32xf32>
      %104 = arith.addf %101, %103 : vector<1x32xf32>
      %c4_42 = arith.constant 4 : index
      %c0_43 = arith.constant 0 : index
      %105 = vector.load %arg7[%c4_42, %c0_43] : memref<8x32xf32, #tpu.memory_space<vmem>>, vector<1x32xf32>
      tpu.vector_store %arg7[%c4_42, %c0_43], %104 {strides = array<i32>} : memref<8x32xf32, #tpu.memory_space<vmem>>, vector<1x32xf32>,
      %c5_44 = arith.constant 5 : index
      %c0_45 = arith.constant 0 : index
      %106 = vector.load %arg7[%c5_44, %c0_45] : memref<8x32xf32, #tpu.memory_space<vmem>>, vector<1x32xf32>
      %107 = arith.mulf %100, %100 : vector<64x32xf32>
      %cst_46 = arith.constant dense<0.000000e+00> : vector<32xf32>
      %108 = vector.multi_reduction <add>, %107, %cst_46 [0] : vector<64x32xf32> to vector<32xf32>
      %109 = vector.shape_cast %108 : vector<32xf32> to vector<1x32xf32>
      %110 = arith.addf %106, %109 : vector<1x32xf32>
      %c5_47 = arith.constant 5 : index
      %c0_48 = arith.constant 0 : index
      %111 = vector.load %arg7[%c5_47, %c0_48] : memref<8x32xf32, #tpu.memory_space<vmem>>, vector<1x32xf32>
      tpu.vector_store %arg7[%c5_47, %c0_48], %110 {strides = array<i32>} : memref<8x32xf32, #tpu.memory_space<vmem>>, vector<1x32xf32>,
      %112 = vector.shape_cast %100 : vector<64x32xf32> to vector<4x16x32xf32>
      %cst_49 = arith.constant dense<0.000000e+00> : vector<4x32xf32>
      %113 = vector.multi_reduction <add>, %112, %cst_49 [1] : vector<4x16x32xf32> to vector<4x32xf32>
      %cst_50 = arith.constant 1.600000e+01 : f32
      %114 = vector.broadcast %cst_50 : f32 to vector<4x32xf32>
      %115 = arith.divf %113, %114 : vector<4x32xf32>
      %c0_51 = arith.constant 0 : index
      %c0_52 = arith.constant 0 : index
      %116 = vector.load %arg6[%c0_51, %c0_52] : memref<4x32xf32, #tpu.memory_space<vmem>>, vector<4x32xf32>
      tpu.vector_store %arg6[%c0_51, %c0_52], %115 {strides = array<i32>} : memref<4x32xf32, #tpu.memory_space<vmem>>, vector<4x32xf32>,
    } else {
    }
    return
  }
  func.func @transform_0(%arg0: i32, %arg1: i32) -> (i32, i32, i32) {
    %c0_i32 = arith.constant 0 : i32
    %c0_i32_0 = arith.constant 0 : i32
    %c0_i32_1 = arith.constant 0 : i32
    return %arg1, %c0_i32, %c0_i32_0 : i32, i32, i32
  }
  func.func @transform_1(%arg0: i32, %arg1: i32) -> (i32, i32) {
    %c0_i32 = arith.constant 0 : i32
    %c0_i32_0 = arith.constant 0 : i32
    %c0_i32_1 = arith.constant 0 : i32
    return %c0_i32, %c0_i32_0 : i32, i32
  }
  func.func @transform_2(%arg0: i32, %arg1: i32) -> (i32, i32) {
    %c0_i32 = arith.constant 0 : i32
    %c0_i32_0 = arith.constant 0 : i32
    %c0_i32_1 = arith.constant 0 : i32
    return %c0_i32, %c0_i32_0 : i32, i32
  }
  func.func @transform_3(%arg0: i32, %arg1: i32) -> (i32, i32) {
    %c0_i32 = arith.constant 0 : i32
    %c0_i32_0 = arith.constant 0 : i32
    %c0_i32_1 = arith.constant 0 : i32
    return %c0_i32, %c0_i32_0 : i32, i32
  }
  func.func @transform_4(%arg0: i32, %arg1: i32) -> (i32, i32) {
    %c0_i32 = arith.constant 0 : i32
    %c0_i32_0 = arith.constant 0 : i32
    return %arg1, %c0_i32 : i32, i32
  }
  func.func @transform_5(%arg0: i32, %arg1: i32) -> (i32, i32) {
    %c0_i32 = arith.constant 0 : i32
    %c0_i32_0 = arith.constant 0 : i32
    %c0_i32_1 = arith.constant 0 : i32
    return %c0_i32, %c0_i32_0 : i32, i32
  }
}

</mosaic_0001>

<bundles_post_ra>
// kernel: tpu_custom_call.1
= control target key start
LH: loop header
LB: loop body
LE: loop exit
PB: predicated region body
PF: predicated region fallthrough
CT: control target
= control target key end

     0   :  { %11 = vsyncpa [#allocation4], 0  ;;  %s2945_s0 = inlined_call_operand.vmem [shape: f32[4,22,1], index: 0, kind: input, shape index: {}]   ;;  %s2946_s1 = inlined_call_operand.vmem [shape: f32[7,32], index: 1, kind: input, shape index: {}]   ;;  %s2947_s2 = inlined_call_operand.vmem [shape: bf16[224,32], index: 2, kind: input, shape index: {}]   ;;  %s2948_s3 = inlined_call_operand.vmem [shape: f32[8,32], index: 3, kind: input, shape index: {}]   ;;  %s2949_s4 = inlined_call_operand.hbm [shape: f32[4,32], index: 4, kind: output, shape index: {0}]   ;;  %s2950_s5 = inlined_call_operand.hbm [shape: f32[8,32], index: 5, kind: output, shape index: {1}]  }
   0x1   :  { %12 = vsyncpa [#allocation6], 0  ;;  %s2112_s18 = smov 0   ;;  %s2114_s19 = smov 0  }
   0x2   :  { %s2116_s20 = smov 0  }
   0x3 LB: > { %s1822_s21 = sadd.s32 4294967295, %s2072_s20   ;;  %s30_s22 = sadd.s32 1, %s2068_s19  ;;  %s2072_s20 = sphi %s2116_s20, %s18_s20   ;;  %s2068_s19 = sphi %s2114_s19, %s3005_s19   ;;  %s2064_s18 = sphi %s2112_s18, %s3004_s18  }
   0x4   : > { %p32_p0 = scmp.ge.s32.totalorder %s30_s22, 2  ;;  %p1825_p1 = scmp.ge.s32.totalorder %s2072_s20, 1 }
   0x5   : > { %p201_p2 = scmp.lt.s32.totalorder %s2072_s20, 3 }
   0x6   : > { %s3007_s22 = smov (%p32_p0, %s30_s22), 0 }
   0x7   : > { %p202_p3 = pnand %p1825_p1, %p201_p2 }
   0x9   : > { %205 = sbr.rel (%p202_p3) target bundleno = 668 (0x29c), region = 36 }
   0xe   : > { %v2136_v0 = vld [vmem:[%s2948_s3] sm:$0xff]  ;;  %p234_p4 = scmp.eq.s32.totalorder %s2064_s18, 0 }
   0xf   : > { %2964 = vst [vmem:[#allocation9_spill] sm:$0xff] %v2136_v0  ;;  %vm240_vm0 = vcmask (%p234_p4), 261120   ;;  %vm242_vm1 = vcmask (%p234_p4), 254976   ;;  %vm243_vm2 = vsmask.f32 (%p234_p4), 1280  ;;  %v2074_v1 = vmov (%p234_p4), 0.0  }
  0x10   : > { %239 = sbr.rel (!%p234_p4) target bundleno = 26 (0x1a), region = 40  ;;  %241 = vst.msk [vmem:[#allocation5] sm:$0xff] (%p234_p4), %vm240_vm0, %v2074_v1  ;;  %vm2139_vm3 = vmand (%p234_p4), %vm242_vm1, %vm243_vm2  ;;  %v245_v3 = vld [vmem:[#allocation2] sm:$0x3] (%p234_p4)  ;;  %v248_v4 = vld [vmem:[#allocation2 + $0xc] sm:$0x3] (%p234_p4) }
  0x11   : > { %vm257_vm4 = vcmask (%p234_p4), 256001   ;;  %v246_v5 = vsel (%p234_p4), %vm2139_vm3, 0, %v245_v3  ;;  %v249_v6 = vsel (%p234_p4), %vm2139_vm3, 0, %v248_v4  ;;  %v251_v7 = vld [vmem:[#allocation2 + $0x18] sm:$0x3] (%p234_p4) }
  0x12   : > { %v254_v8 = vld [vmem:[#allocation2 + $0x24] sm:$0x3] (%p234_p4)  ;;  %247 = vst [vmem:[#allocation2] sm:$0x3] (%p234_p4), %v246_v5  ;;  %v252_v9 = vsel (%p234_p4), %vm2139_vm3, 0, %v251_v7 }
  0x13   : > { %v255_v10 = vsel (%p234_p4), %vm2139_vm3, 0, %v254_v8  ;;  %vm258_vm5 = vsmask.f32 (%p234_p4), 7942  ;;  %250 = vst [vmem:[#allocation2 + $0xc] sm:$0x3] (%p234_p4), %v249_v6 }
  0x14   : > { %vm259_vm6 = vmand (%p234_p4), %vm257_vm4, %vm258_vm5  ;;  %v260_v11 = vld [vmem:[#allocation2 + $0x8] sm:$0x6] (%p234_p4)  ;;  %v263_v12 = vld [vmem:[#allocation2 + $0x14] sm:$0x6] (%p234_p4)  ;;  %253 = vst [vmem:[#allocation2 + $0x18] sm:$0x3] (%p234_p4), %v252_v9 }
  0x15   : > { %v261_v13 = vsel %vm259_vm6, 0, %v260_v11  ;;  %v264_v14 = vsel %vm259_vm6, 0, %v263_v12  ;;  %v266_v15 = vld [vmem:[#allocation2 + $0x20] sm:$0x6]  ;;  %256 = vst [vmem:[#allocation2 + $0x24] sm:$0x3] %v255_v10 }
  0x16   : > { %v267_v16 = vsel %vm259_vm6, 0, %v266_v15  ;;  %v269_v17 = vld [vmem:[#allocation2 + $0x2c] sm:$0x6]  ;;  %262 = vst [vmem:[#allocation2 + $0x8] sm:$0x6] %v261_v13 }
  0x17   : > { %v270_v18 = vsel %vm259_vm6, 0, %v269_v17  ;;  %265 = vst [vmem:[#allocation2 + $0x14] sm:$0x6] %v264_v14 }
  0x18   : > { %268 = vst [vmem:[#allocation2 + $0x20] sm:$0x6] %v267_v16 }
  0x19   : > { %271 = vst [vmem:[#allocation2 + $0x2c] sm:$0x6] %v270_v18 }
  0x1a PF: > { %v278_v19 = vld [vmem:[%s2945_s0 + $0x30] sm:$0xff]  ;;  %v275_v20 = vld [vmem:[%s2945_s0 + $0x18] sm:$0xff]  ;;  %v272_v21 = vld [vmem:[%s2945_s0] sm:$0xff]  ;;  %v2075_v22 = vmov 0   ;;  %vm379_vm7 = vcmask 1046528   ;;  %vm441_vm8 = vcmask 1045504  }
  0x1b   : > { %1979 = vset.pattern.permute.xlu2 %v2075_v22  ;;  %1978 = vset.pattern.permute.xlu1 %v2075_v22  ;;  %v279_v23 = vld [vmem:[%s2945_s0 + $0x38] sm:$0xff]  ;;  %v276_v24 = vld [vmem:[%s2945_s0 + $0x20] sm:$0xff]  ;;  %v273_v25 = vld [vmem:[%s2945_s0 + $0x8] sm:$0xff]  ;;  %vm503_vm9 = vcmask 1044480   ;;  %vm565_vm10 = vcmask 1043456   ;;  %vm627_vm11 = vcmask 1042432  }
  0x1c   : > { %1977 = vset.pattern.permute.xlu0 %v2075_v22  ;;  %307 = vperm.xlu2 %1979, %v278_v19   ;;  %v274_v26 = vld [vmem:[%s2945_s0 + $0x10] sm:$0x3f]  ;;  %v281_v28 = vld [vmem:[%s2945_s0 + $0x48] sm:$0xff]  ;;  %v283_v29 = vld [vmem:[%s2945_s0 + $0x58] sm:$0x3f]  ;;  %vm689_vm12 = vcmask 1041408  }
  0x1d   : > { %297 = vperm.xlu1 %1978, %v275_v20   ;;  %287 = vperm.xlu0 %1977, %v272_v21   ;;  %v282_v27 = vld [vmem:[%s2945_s0 + $0x50] sm:$0xff]  ;;  %v280_v30 = vld [vmem:[%s2945_s0 + $0x40] sm:$0x3f]  ;;  %v277_v31 = vld [vmem:[%s2945_s0 + $0x28] sm:$0x3f]  ;;  %v2266_v19 = vperm.slane %v2136_v0, 0 }
  0x1e   : > { %v284_v32 = vld [vmem:[%s2946_s1] sm:$0x7f]  ;;  %p1827_p5 = scmp.ne.s32.totalorder %s2064_s18, 0 }
  0x1f   : > { %v2190_v33 = vperm.slane %v284_v32, 1  ;;  %v2192_v35 = vperm.slane %v284_v32, 2  ;;  %v2194_v36 = vperm.slane %v284_v32, 3  ;;  %v2196_v37 = vperm.slane %v284_v32, 4 }
  0x20   : > { %v2200_v40 = vperm.slane %v284_v32, 0  ;;  %v2202_v41 = vperm.slane %v284_v32, 5  ;;  %v2205_v43 = vperm.slane %v284_v32, 6 }
  0x24   : > { %312 = vperm.xlu2 %1979, %v279_v23  }
  0x25   : > { %302 = vperm.xlu1 %1978, %v276_v24   ;;  %292 = vperm.xlu0 %1977, %v273_v25  }
  0x2c   : > { %336 = vperm.xlu2 %1979, %v274_v26  }
  0x2d   : > { %322 = vperm.xlu1 %1978, %v282_v27   ;;  %317 = vperm.xlu0 %1977, %v281_v28  }
  0x34   : > { %351 = vperm.xlu2 %1979, %v283_v29  }
  0x35   : > { %346 = vperm.xlu1 %1978, %v280_v30   ;;  %341 = vperm.xlu0 %1977, %v277_v31  }
  0x76   : > { %v308_v34 = vpop.permute.xlu2 %307 }
  0x77   : > { %v361_v38 = vmul.f32 %v2190_v33, %v308_v34  ;;  %v423_v39 = vmul.f32 %v2192_v35, %v308_v34  ;;  %v485_v42 = vmul.f32 %v2194_v36, %v308_v34  ;;  %v547_v45 = vmul.f32 %v2196_v37, %v308_v34 }
  0x78   : > { %v330_v51 = vmul.f32 %v2200_v40, %v308_v34  ;;  %v609_v53 = vmul.f32 %v2202_v41, %v308_v34  ;;  %v671_v60 = vmul.f32 %v2205_v43, %v308_v34 }
  0x79   : > { %v390_v44 = vrot.slane %v361_v38, 1  ;;  %v452_v47 = vrot.slane %v423_v39, 2  ;;  %v514_v52 = vrot.slane %v485_v42, 3  ;;  %v576_v59 = vrot.slane %v547_v45, 4 }
  0x7a   : > { %v638_v3 = vrot.slane %v609_v53, 5  ;;  %v700_v8 = vrot.slane %v671_v60, 6 }
  0x7e   : > { %v313_v46 = vpop.permute.xlu2 %312 }
  0x7f   : > { %v2209_v48 = vmul.f32 %v2190_v33, %v313_v46  ;;  %v2212_v49 = vmul.f32 %v2192_v35, %v313_v46  ;;  %v2215_v50 = vmul.f32 %v2194_v36, %v313_v46  ;;  %v2220_v54 = vmul.f32 %v2196_v37, %v313_v46 }
  0x80   : > { %v2226_v58 = vmul.f32 %v2202_v41, %v313_v46  ;;  %v2237_v1 = vmul.f32 %v2205_v43, %v313_v46  ;;  %v2269_v21 = vmul.f32 %v2200_v40, %v313_v46 }
  0x81   : > { %v2956_v55 = vrot.slane %v2209_v48, 1  ;;  %v2955_v56 = vrot.slane %v2212_v49, 2  ;;  %v2954_v57 = vrot.slane %v2215_v50, 3  ;;  %v2953_v63 = vrot.slane %v2220_v54, 4 }
  0x82   : > { %v2952_v5 = vrot.slane %v2226_v58, 5  ;;  %v2951_v10 = vrot.slane %v2237_v1, 6 }
  0x83   : > { %v392_v61 = vsel %vm379_vm7, %v390_v44, %v2956_v55  ;;  %v454_v62 = vsel %vm441_vm8, %v452_v47, %v2955_v56  ;;  %v516_v4 = vsel %vm503_vm9, %v514_v52, %v2954_v57  ;;  %v578_v9 = vsel %vm565_vm10, %v576_v59, %v2953_v63 }
  0x84   : > { %v412_v2 = vadd.f32 %v392_v61, %v330_v51  ;;  %v640_v12 = vsel %vm627_vm11, %v638_v3, %v2952_v5  ;;  %v702_v15 = vsel %vm689_vm12, %v700_v8, %v2951_v10 }
  0x86   : > { %v474_v6 = vadd.f32 %v454_v62, %v412_v2  ;;  %v337_v7 = vpop.permute.xlu2 %336 }
  0x87   : > { %v2251_v14 = vmul.f32 %v2190_v33, %v337_v7  ;;  %v2257_v16 = vmul.f32 %v2192_v35, %v337_v7  ;;  %v2260_v17 = vmul.f32 %v2194_v36, %v337_v7  ;;  %v2263_v18 = vmul.f32 %v2196_v37, %v337_v7 }
  0x88   : > { %v536_v11 = vadd.f32 %v516_v4, %v474_v6  ;;  %v2273_v24 = vmul.f32 %v2202_v41, %v337_v7  ;;  %v2276_v25 = vmul.f32 %v2205_v43, %v337_v7 }
  0x8a   : > { %v598_v13 = vadd.f32 %v578_v9, %v536_v11 }
  0x8c   : > { %v660_v20 = vadd.f32 %v640_v12, %v598_v13 }
  0x8e   : > { %v722_v22 = vadd.f32 %v702_v15, %v660_v20  ;;  %v2278_v26 = vpop.permute.xlu2 %351 }
  0x8f   : > { %v298_v30 = vpop.permute.xlu1 %297  ;;  %v2285_v31 = vmul.f32 %v2190_v33, %v2278_v26  ;;  %v288_v32 = vpop.permute.xlu0 %287  ;;  %v2292_v42 = vmul.f32 %v2192_v35, %v2278_v26  ;;  %v2304_v59 = vmul.f32 %v2194_v36, %v2278_v26  ;;  %v2309_v2 = vmul.f32 %v2196_v37, %v2278_v26 }
  0x90   : > { %v731_v34 = vadd.f32 %v2266_v19, %v722_v22  ;;  %v358_v38 = vmul.f32 %v2190_v33, %v298_v30  ;;  %v420_v39 = vmul.f32 %v2192_v35, %v298_v30  ;;  %v482_v44 = vmul.f32 %v2194_v36, %v298_v30 }
  0x91   : > { %v544_v45 = vmul.f32 %v2196_v37, %v298_v30  ;;  %v606_v46 = vmul.f32 %v2202_v41, %v298_v30  ;;  %v668_v47 = vmul.f32 %v2205_v43, %v298_v30  ;;  %v328_v60 = vmul.f32 %v2200_v40, %v298_v30 }
  0x92   : > { %v2298_v51 = vmax.f32 %v731_v34, 0.0  ;;  %v385_v61 = vrot.slane %v358_v38, 1  ;;  %v447_v62 = vrot.slane %v420_v39, 2  ;;  %v509_v3 = vrot.slane %v482_v44, 3 }
  0x93   : > { %v571_v4 = vrot.slane %v544_v45, 4  ;;  %v633_v6 = vrot.slane %v606_v46, 5  ;;  %v695_v8 = vrot.slane %v668_v47, 6  ;;  %v355_v11 = vmul.f32 %v2190_v33, %v288_v32 }
  0x94   : > { %2967 = vst [vmem:[#allocation10_spill] sm:$0xff] %v2298_v51  ;;  %v417_v12 = vmul.f32 %v2192_v35, %v288_v32  ;;  %v479_v15 = vmul.f32 %v2194_v36, %v288_v32  ;;  %v541_v20 = vmul.f32 %v2196_v37, %v288_v32  ;;  %v2319_v22 = vmul.f32 %v2202_v41, %v288_v32 }
  0x95   : > { %v2323_v30 = vmul.f32 %v2202_v41, %v2278_v26  ;;  %v326_v34 = vmul.f32 %v2200_v40, %v288_v32  ;;  %v380_v38 = vrot.slane %v355_v11, 1  ;;  %v2327_v39 = vmul.f32 %v2205_v43, %v288_v32 }
  0x96   : > { %v442_v46 = vrot.slane %v417_v12, 2  ;;  %v504_v47 = vrot.slane %v479_v15, 3  ;;  %v566_v10 = vrot.slane %v541_v20, 4  ;;  %v628_v5 = vrot.slane %v2319_v22, 5 }
  0x97   : > { %v2329_v44 = vpop.permute.xlu1 %302  ;;  %v293_v45 = vpop.permute.xlu0 %292  ;;  %v690_v63 = vrot.slane %v2327_v39, 6 }
  0x98   : > { %v2335_v57 = vmul.f32 %v2190_v33, %v2329_v44  ;;  %v2339_v11 = vmul.f32 %v2192_v35, %v2329_v44  ;;  %v2343_v32 = vmul.f32 %v2194_v36, %v2329_v44  ;;  %v2347_v12 = vmul.f32 %v2196_v37, %v2329_v44 }
  0x99   : > { %v2351_v15 = vmul.f32 %v2202_v41, %v2329_v44  ;;  %v2355_v20 = vmul.f32 %v2205_v43, %v2329_v44  ;;  %v327_v22 = vmul.f32 %v2200_v40, %v293_v45  ;;  %v356_v13 = vmul.f32 %v2190_v33, %v293_v45 }
  0x9a   : > { %v2960_v39 = vrot.slane %v2335_v57, 1  ;;  %v2961_v56 = vrot.slane %v2339_v11, 2  ;;  %v2962_v55 = vrot.slane %v2343_v32, 3  ;;  %v418_v52 = vmul.f32 %v2192_v35, %v293_v45 }
  0x9b   : > { %2968 = vst [vmem:[#allocation11_spill] sm:$0xff] %v2355_v20  ;;  %v381_v23 = vrot.slane %v356_v13, 1  ;;  %v2969_v7 = vrot.slane %v2347_v12, 4  ;;  %v2970_v0 = vrot.slane %v2351_v15, 5 }
  0x9c   : > { %v387_v29 = vsel %vm379_vm7, %v385_v61, %v2960_v39  ;;  %v449_v28 = vsel %vm441_vm8, %v447_v62, %v2961_v56  ;;  %v511_v27 = vsel %vm503_vm9, %v509_v3, %v2962_v55  ;;  %v2971_v61 = vrot.slane %v2355_v20, 6 }
  0x9d   : > { %v410_v9 = vadd.f32 %v387_v29, %v328_v60  ;;  %v573_v53 = vsel %vm565_vm10, %v571_v4, %v2969_v7  ;;  %v635_v51 = vsel %vm627_vm11, %v633_v6, %v2970_v0  ;;  %v382_v62 = vsel %vm379_vm7, %v380_v38, %v381_v23 }
  0x9e   : > { %v697_v39 = vsel %vm689_vm12, %v695_v8, %v2971_v61  ;;  %v2972_v56 = vrot.slane %v2251_v14, 1  ;;  %v443_v13 = vrot.slane %v418_v52, 2  ;;  %v480_v29 = vmul.f32 %v2194_v36, %v293_v45 }
  0x9f   : > { %v472_v60 = vadd.f32 %v449_v28, %v410_v9  ;;  %v408_v55 = vadd.f32 %v382_v62, %v326_v34  ;;  %v542_v7 = vmul.f32 %v2196_v37, %v293_v45  ;;  %v2973_v6 = vrot.slane %v2257_v16, 2 }
  0xa0   : > { %v384_v3 = vsel %vm379_vm7, %v381_v23, %v2972_v56  ;;  %v444_v0 = vsel %vm441_vm8, %v442_v46, %v443_v13  ;;  %v505_v61 = vrot.slane %v480_v29, 3  ;;  %v604_v38 = vmul.f32 %v2202_v41, %v293_v45 }
  0xa1   : > { %v409_v4 = vadd.f32 %v384_v3, %v327_v22  ;;  %v446_v8 = vsel %vm441_vm8, %v443_v13, %v2973_v6  ;;  %v534_v14 = vadd.f32 %v511_v27, %v472_v60  ;;  %v470_v20 = vadd.f32 %v444_v0, %v408_v55  ;;  %v323_v22 = vpop.permute.xlu1 %322 }
  0xa2   : > { %v567_v23 = vrot.slane %v542_v7, 4  ;;  %v506_v52 = vsel %vm503_vm9, %v504_v47, %v505_v61  ;;  %v2974_v28 = vrot.slane %v2260_v17, 3  ;;  %v629_v34 = vrot.slane %v604_v38, 5 }
  0xa3   : > { %v471_v56 = vadd.f32 %v446_v8, %v409_v4  ;;  %v666_v46 = vmul.f32 %v2205_v43, %v293_v45  ;;  %v596_v16 = vadd.f32 %v573_v53, %v534_v14  ;;  %v532_v62 = vadd.f32 %v506_v52, %v470_v20 }
  0xa4   : > { %v508_v9 = vsel %vm503_vm9, %v505_v61, %v2974_v28  ;;  %v568_v13 = vsel %vm565_vm10, %v566_v10, %v567_v23  ;;  %v2975_v27 = vrot.slane %v2263_v18, 4  ;;  %v630_v29 = vsel %vm627_vm11, %v628_v5, %v629_v34 }
  0xa5   : > { %v533_v3 = vadd.f32 %v508_v9, %v471_v56  ;;  %v2976_v47 = vrot.slane %v2273_v24, 5  ;;  %v691_v60 = vrot.slane %v666_v46, 6  ;;  %v658_v4 = vadd.f32 %v635_v51, %v596_v16 }
  0xa6   : > { %v570_v55 = vsel %vm565_vm10, %v567_v23, %v2975_v27  ;;  %v594_v7 = vadd.f32 %v568_v13, %v532_v62  ;;  %v333_v53 = vmul.f32 %v2200_v40, %v323_v22  ;;  %v2977_v10 = vrot.slane %v2276_v25, 6  ;;  %v318_v27 = vpop.permute.xlu0 %317 }
  0xa7   : > { %v632_v17 = vsel %vm627_vm11, %v629_v34, %v2976_v47  ;;  %v595_v45 = vadd.f32 %v570_v55, %v533_v3  ;;  %v692_v20 = vsel %vm689_vm12, %v690_v63, %v691_v60  ;;  %v365_v0 = vmul.f32 %v2190_v33, %v323_v22 }
  0xa8   : > { %v694_v18 = vsel %vm689_vm12, %v691_v60, %v2977_v10  ;;  %v427_v5 = vmul.f32 %v2192_v35, %v323_v22  ;;  %v720_v6 = vadd.f32 %v697_v39, %v658_v4  ;;  %v656_v24 = vadd.f32 %v630_v29, %v594_v7 }
  0xa9   : > { %v657_v8 = vadd.f32 %v632_v17, %v595_v45  ;;  %v489_v61 = vmul.f32 %v2194_v36, %v323_v22  ;;  %v396_v51 = vrot.slane %v365_v0, 1  ;;  %v2417_v14 = vmul.f32 %v2196_v37, %v323_v22  ;;  %v347_v0 = vpop.permute.xlu1 %346 }
  0xaa   : > { %v458_v38 = vrot.slane %v427_v5, 2  ;;  %v2420_v63 = vmul.f32 %v2202_v41, %v323_v22  ;;  %v729_v25 = vadd.f32 %v2266_v19, %v720_v6  ;;  %v718_v56 = vadd.f32 %v692_v20, %v656_v24 }
  0xab   : > { %v719_v23 = vadd.f32 %v694_v18, %v657_v8  ;;  %v520_v52 = vrot.slane %v489_v61, 3  ;;  %v584_v28 = vrot.slane %v2309_v2, 4  ;;  %v646_v39 = vrot.slane %v2323_v30, 5 }
  0xac   : > { %v676_v9 = vmul.f32 %v2205_v43, %v2278_v26  ;;  %v2978_v34 = vrot.slane %v2285_v31, 1  ;;  %v2430_v16 = vmax.f32 %v729_v25, 0.0  ;;  %v727_v62 = vadd.f32 %v2266_v19, %v718_v56 }
  0xad   : > { %v728_v3 = vadd.f32 %v2266_v19, %v719_v23  ;;  %v2979_v55 = vrot.slane %v2292_v42, 2  ;;  %v582_v30 = vrot.slane %v2417_v14, 4  ;;  %v644_v26 = vrot.slane %v2420_v63, 5 }
  0xae   : > { %v399_v46 = vsel %vm379_vm7, %v396_v51, %v2978_v34  ;;  %v675_v31 = vmul.f32 %v2205_v43, %v323_v22  ;;  %v2440_v29 = vmax.f32 %v727_v62, 0.0  ;;  %v2980_v60 = vrot.slane %v2304_v59, 3 }
  0xaf   : > { %v415_v13 = vadd.f32 %v399_v46, %v333_v53  ;;  %v461_v2 = vsel %vm441_vm8, %v458_v38, %v2979_v55  ;;  %v2442_v47 = vmax.f32 %v728_v3, 0.0  ;;  %v364_v42 = vmul.f32 %v2190_v33, %v318_v27 }
  0xb0   : > { %v523_v4 = vsel %vm503_vm9, %v520_v52, %v2980_v60  ;;  %v706_v7 = vrot.slane %v675_v31, 6  ;;  %v426_v45 = vmul.f32 %v2192_v35, %v318_v27  ;;  %v488_v53 = vmul.f32 %v2194_v36, %v318_v27 }
  0xb1   : > { %v477_v17 = vadd.f32 %v461_v2, %v415_v13  ;;  %v550_v10 = vmul.f32 %v2196_v37, %v318_v27  ;;  %v612_v22 = vmul.f32 %v2202_v41, %v318_v27  ;;  %v674_v18 = vmul.f32 %v2205_v43, %v318_v27 }
  0xb2   : > { %v708_v5 = vrot.slane %v676_v9, 6  ;;  %v585_v59 = vsel %vm565_vm10, %v582_v30, %v584_v28  ;;  %v395_v6 = vrot.slane %v364_v42, 1  ;;  %v457_v24 = vrot.slane %v426_v45, 2 }
  0xb3   : > { %v539_v20 = vadd.f32 %v523_v4, %v477_v17  ;;  %v647_v61 = vsel %vm627_vm11, %v644_v26, %v646_v39  ;;  %v332_v14 = vmul.f32 %v2200_v40, %v318_v27  ;;  %v519_v63 = vrot.slane %v488_v53, 3 }
  0xb4   : > { %v709_v25 = vsel %vm689_vm12, %v706_v7, %v708_v5  ;;  %v397_v56 = vsel %vm379_vm7, %v395_v6, %v396_v51  ;;  %v581_v23 = vrot.slane %v550_v10, 4  ;;  %v363_v34 = vmul.f32 %v2190_v33, %v347_v0 }
  0xb5   : > { %v601_v8 = vadd.f32 %v585_v59, %v539_v20  ;;  %v414_v62 = vadd.f32 %v397_v56, %v332_v14  ;;  %v643_v9 = vrot.slane %v612_v22, 5  ;;  %v705_v3 = vrot.slane %v674_v18, 6  ;;  %v342_v22 = vpop.permute.xlu0 %341 }
  0xb6   : > { %v459_v28 = vsel %vm441_vm8, %v457_v24, %v458_v38  ;;  %v393_v13 = vrot.slane %v363_v34, 1  ;;  %v425_v55 = vmul.f32 %v2192_v35, %v347_v0  ;;  %v487_v39 = vmul.f32 %v2194_v36, %v347_v0 }
  0xb7   : > { %v663_v46 = vadd.f32 %v647_v61, %v601_v8  ;;  %v476_v2 = vadd.f32 %v459_v28, %v414_v62  ;;  %v521_v31 = vsel %vm503_vm9, %v519_v63, %v520_v52  ;;  %v549_v51 = vmul.f32 %v2196_v37, %v347_v0 }
  0xb8   : > { %v2981_v17 = vrot.slane %v2209_v48, 1  ;;  %v455_v4 = vrot.slane %v425_v55, 2  ;;  %v517_v42 = vrot.slane %v487_v39, 3  ;;  %v611_v45 = vmul.f32 %v2202_v41, %v347_v0 }
  0xb9   : > { %v725_v27 = vadd.f32 %v709_v25, %v663_v46  ;;  %v538_v53 = vadd.f32 %v521_v31, %v476_v2  ;;  %v673_v10 = vmul.f32 %v2205_v43, %v347_v0  ;;  %v583_v52 = vsel %vm565_vm10, %v581_v23, %v582_v30 }
  0xba   : > { %v394_v60 = vsel %vm379_vm7, %v2981_v17, %v393_v13  ;;  %v645_v18 = vsel %vm627_vm11, %v643_v9, %v644_v26  ;;  %v2982_v48 = vrot.slane %v2212_v49, 2  ;;  %v579_v59 = vrot.slane %v549_v51, 4 }
  0xbb   : > { %v734_v38 = vadd.f32 %v2266_v19, %v725_v27  ;;  %v413_v20 = vadd.f32 %v394_v60, %v2269_v21  ;;  %v600_v24 = vadd.f32 %v583_v52, %v538_v53  ;;  %v707_v8 = vsel %vm689_vm12, %v705_v3, %v706_v7 }
  0xbc   : > { %v456_v5 = vsel %vm441_vm8, %v2982_v48, %v455_v4  ;;  %v2983_v21 = vrot.slane %v2215_v50, 3  ;;  %v641_v14 = vrot.slane %v611_v45, 5  ;;  %v360_v30 = vmul.f32 %v2190_v33, %v342_v22 }
  0xbd   : > { %v2476_v6 = vmax.f32 %v734_v38, 0.0  ;;  %v475_v61 = vadd.f32 %v456_v5, %v413_v20  ;;  %v422_v26 = vmul.f32 %v2192_v35, %v342_v22  ;;  %v662_v63 = vadd.f32 %v645_v18, %v600_v24 }
  0xbe   : > { %v518_v0 = vsel %vm503_vm9, %v2983_v21, %v517_v42  ;;  %v703_v25 = vrot.slane %v673_v10, 6  ;;  %v484_v56 = vmul.f32 %v2194_v36, %v342_v22  ;;  %v2984_v23 = vrot.slane %v2220_v54, 4 }
  0xbf   : > { %v537_v49 = vadd.f32 %v518_v0, %v475_v61  ;;  %v388_v7 = vrot.slane %v360_v30, 1  ;;  %v450_v46 = vrot.slane %v422_v26, 2  ;;  %v546_v50 = vmul.f32 %v2196_v37, %v342_v22 }
  0xc0   : > { %v580_v34 = vsel %vm565_vm10, %v2984_v23, %v579_v59  ;;  %v329_v62 = vmul.f32 %v2200_v40, %v2329_v44  ;;  %v724_v9 = vadd.f32 %v707_v8, %v662_v63  ;;  %v2985_v35 = vrot.slane %v2226_v58, 5 }
  0xc1   : > { %v599_v33 = vadd.f32 %v580_v34, %v537_v49  ;;  %v2986_v28 = vrot.slane %v2335_v57, 1  ;;  %v512_v54 = vrot.slane %v484_v56, 3  ;;  %v608_v13 = vmul.f32 %v2202_v41, %v342_v22 }
  0xc2   : > { %v642_v3 = vsel %vm627_vm11, %v2985_v35, %v641_v14  ;;  %v733_v55 = vadd.f32 %v2266_v19, %v724_v9  ;;  %v2987_v27 = vrot.slane %v2237_v1, 6  ;;  %v2988_v44 = vrot.slane %v2339_v11, 2 }
  0xc3   : > { %v389_v36 = vsel %vm379_vm7, %v2986_v28, %v388_v7  ;;  %v661_v39 = vadd.f32 %v642_v3, %v599_v33  ;;  %v574_v2 = vrot.slane %v546_v50, 4  ;;  %v670_v57 = vmul.f32 %v2205_v43, %v342_v22 }
  0xc4   : > { %v411_v37 = vadd.f32 %v389_v36, %v329_v62  ;;  %v704_v40 = vsel %vm689_vm12, %v2987_v27, %v703_v25  ;;  %v451_v58 = vsel %vm441_vm8, %v2988_v44, %v450_v46  ;;  %v2506_v31 = vmax.f32 %v733_v55, 0.0 }
  0xc5   : > { %v723_v51 = vadd.f32 %v704_v40, %v661_v39  ;;  %v2989_v41 = vrot.slane %v2343_v32, 3  ;;  %v636_v4 = vrot.slane %v608_v13, 5  ;;  %v2990_v45 = vrot.slane %v2347_v12, 4  ;;  %v2992_v32 = vld [vmem:[#allocation11_spill] sm:$0xff] }
  0xc6   : > { %v473_v17 = vadd.f32 %v451_v58, %v411_v37  ;;  %v698_v38 = vrot.slane %v670_v57, 6  ;;  %v2991_v20 = vrot.slane %v2351_v15, 5  ;;  %v2993_v52 = vrot.slane %v2992_v32, 6 }
  0xc7   : > { %v513_v60 = vsel %vm503_vm9, %v2989_v41, %v512_v54  ;;  %v732_v1 = vadd.f32 %v2266_v19, %v723_v51  ;;  %v575_v11 = vsel %vm565_vm10, %v2990_v45, %v574_v2 }
  0xc8   : > { %v535_v42 = vadd.f32 %v513_v60, %v473_v17  ;;  %v637_v10 = vsel %vm627_vm11, %v2991_v20, %v636_v4  ;;  %v699_v18 = vsel %vm689_vm12, %v2993_v52, %v698_v38 }
  0xc9   : > { %v2515_v53 = vmax.f32 %v732_v1, 0.0 }
  0xca   : > { %v597_v43 = vadd.f32 %v575_v11, %v535_v42 }
  0xcc   : > { %v659_v22 = vadd.f32 %v637_v10, %v597_v43 }
  0xce   : > { %v721_v48 = vadd.f32 %v699_v18, %v659_v22  ;;  %745 = sbr.rel (%p1827_p5) target bundleno = 244 (0xf4), region = 44 }
  0xd0   : > { %v730_v5 = vadd.f32 %v2266_v19, %v721_v48 }
  0xd2   : > { %v2524_v59 = vmax.f32 %v730_v5, 0.0 }
  0xd3   : > { %vm747_vm13 = vcmask 261120   ;;  %v773_v12 = vmul.f32 %v2440_v29, %v2440_v29  ;;  %v774_v19 = vmul.f32 %v2442_v47, %v2442_v47  ;;  %v775_v0 = vmul.f32 %v2430_v16, %v2430_v16  ;;  %v2994_v26 = vld [vmem:[#allocation10_spill] sm:$0xff]  ;;  %v746_v38 = vld [vmem:[#allocation5] sm:$0x1]  ;;  %v772_v32 = vld [vmem:[#allocation5 + $0x1] sm:$0x1] }
  0xd4   : > { %v748_v15 = vsel %vm747_vm13, %v2440_v29, 0.0  ;;  %v749_v24 = vsel %vm747_vm13, %v2442_v47, 0.0  ;;  %v751_v8 = vsel %vm747_vm13, %v2430_v16, 0.0  ;;  %v753_v21 = vsel %vm747_vm13, %v2524_v59, 0.0 }
  0xd5   : > { %v750_v61 = vadd.f32 %v749_v24, %v748_v15  ;;  %v776_v14 = vmul.f32 %v2524_v59, %v2524_v59  ;;  %v755_v63 = vsel %vm747_vm13, %v2994_v26, 0.0  ;;  %v777_v49 = vmul.f32 %v2994_v26, %v2994_v26 }
  0xd6   : > { %v781_v25 = vsel %vm747_vm13, %v773_v12, 0.0  ;;  %v782_v56 = vsel %vm747_vm13, %v774_v19, 0.0  ;;  %v784_v23 = vsel %vm747_vm13, %v775_v0, 0.0  ;;  %v757_v46 = vsel %vm747_vm13, %v2515_v53, 0.0 }
  0xd7   : > { %v752_v30 = vadd.f32 %v751_v8, %v750_v61  ;;  %v783_v7 = vadd.f32 %v782_v56, %v781_v25  ;;  %v778_v50 = vmul.f32 %v2515_v53, %v2515_v53  ;;  %v786_v62 = vsel %vm747_vm13, %v776_v14, 0.0 }
  0xd8   : > { %v759_v35 = vsel %vm747_vm13, %v2506_v31, 0.0  ;;  %v779_v3 = vmul.f32 %v2506_v31, %v2506_v31  ;;  %v788_v28 = vsel %vm747_vm13, %v777_v49, 0.0  ;;  %v761_v13 = vsel %vm747_vm13, %v2476_v6, 0.0 }
  0xd9   : > { %v754_v34 = vadd.f32 %v753_v21, %v752_v30  ;;  %v785_v33 = vadd.f32 %v784_v23, %v783_v7  ;;  %v780_v55 = vmul.f32 %v2476_v6, %v2476_v6  ;;  %v790_v39 = vsel %vm747_vm13, %v778_v50, 0.0 }
  0xda   : > { %v792_v40 = vsel %vm747_vm13, %v779_v3, 0.0  ;;  %vm770_vm14 = vcmask 253952  }
  0xdb   : > { %v756_v9 = vadd.f32 %v755_v63, %v754_v34  ;;  %v787_v54 = vadd.f32 %v786_v62, %v785_v33  ;;  %v794_v2 = vsel %vm747_vm13, %v780_v55, 0.0 }
  0xdd   : > { %v758_v36 = vadd.f32 %v757_v46, %v756_v9  ;;  %v789_v27 = vadd.f32 %v788_v28, %v787_v54 }
  0xdf   : > { %v760_v37 = vadd.f32 %v759_v35, %v758_v36  ;;  %v791_v58 = vadd.f32 %v790_v39, %v789_v27 }
  0xe1   : > { %v762_v44 = vadd.f32 %v761_v13, %v760_v37  ;;  %v793_v51 = vadd.f32 %v792_v40, %v791_v58 }
  0xe3   : > { %v763_v57 = vrot.slane %v762_v44, 4  ;;  %v795_v41 = vadd.f32 %v794_v2, %v793_v51 }
  0xe5   : > { %v764_v17 = vadd.f32 %v763_v57, %v762_v44  ;;  %v796_v4 = vrot.slane %v795_v41, 4 }
  0xe7   : > { %v765_v60 = vrot.slane %v764_v17, 2  ;;  %v797_v42 = vadd.f32 %v796_v4, %v795_v41 }
  0xe9   : > { %v766_v1 = vadd.f32 %v765_v60, %v764_v17  ;;  %v798_v11 = vrot.slane %v797_v42, 2 }
  0xeb   : > { %v767_v45 = vrot.slane %v766_v1, 1  ;;  %v799_v20 = vadd.f32 %v798_v11, %v797_v42 }
  0xed   : > { %v768_v43 = vadd.f32 %v767_v45, %v766_v1  ;;  %v800_v22 = vrot.slane %v799_v20, 1 }
  0xef   : > { %v769_v10 = vadd.f32 %v768_v43, %v746_v38  ;;  %v801_v52 = vadd.f32 %v800_v22, %v799_v20 }
  0xf1   : > { %771 = vst.msk [vmem:[#allocation5] sm:$0x1] %vm770_vm14, %v769_v10  ;;  %v802_v18 = vadd.f32 %v801_v52, %v772_v32 }
  0xf3   : > { %803 = vst.msk [vmem:[#allocation5 + $0x1] sm:$0x1] %vm770_vm14, %v802_v18 }
  0xf4 PF: > { %p1828_p6 = scmp.ne.s32.totalorder %s2064_s18, 1 }
  0xf5   : > { %s2076_s18 = smov (!%p1828_p6), 64   ;;  %s2077_s6 = smov (!%p1828_p6), 32  }
  0xf6   : > { %807 = sbr.rel (%p1828_p6) target bundleno = 658 (0x292), region = 48  ;;  %s2078_s7 = smov (!%p1828_p6), 96  }
  0xfb   : > { %v811_v48 = vld [vmem:[#allocation5] sm:$0x1]  ;;  %v813_v5 = vld [vmem:[#allocation5 + $0x1] sm:$0x1]  ;;  %vm818_vm15 = vcmask 253952   ;;  %vm835_vm3 = vcmask 254977  }
  0xfc   : > { %v812_v12 = vmul.f32 0.015625, %v811_v48  ;;  %v814_v15 = vmul.f32 0.015625, %v813_v5  ;;  %v2995_v56 = vld [vmem:[#allocation9_spill] sm:$0xff]  ;;  %v2996_v9 = vld [vmem:[#allocation10_spill] sm:$0xff]  ;;  %vm874_vm4 = vsmask.f32 1280 }
  0xfd   : > { %v2577_v28 = vperm.slane %v2995_v56, 2  ;;  %vm875_vm5 = vsmask.f32 5392  ;;  %vm965_vm6 = vcmask 257025   ;;  %vm966_vm10 = vsmask.f32 7942 }
  0xfe   : > { %v815_v24 = vmul.f32 %v812_v12, %v812_v12  ;;  %819 = vst.msk [vmem:[#allocation5 + $0x2] sm:$0x1] %vm818_vm15, %v812_v12  ;;  %vm973_vm11 = vcmask 254976   ;;  %vm971_vm12 = vcmask 257024   ;;  %vm2590_vm13 = vmand %vm965_vm6, %vm966_vm10  ;;  %v978_v48 = vld [vmem:[#allocation2 + $0xc] sm:$0xe] }
  0xff   : > { %vm2596_vm14 = vmor %vm874_vm4, %vm875_vm5  ;;  %vm1726_vm5 = vcmask 1041409   ;;  %vm1728_vm6 = vcmask 1042434   ;;  %vm1730_vm10 = vcmask 1043459  }
 0x100   : > { %v816_v8 = vsub.f32 %v814_v15, %v815_v24 }
 0x102   : > { %v817_v19 = vmax.f32 %v816_v8, 0.0 }
 0x104   : > { %v820_v61 = vadd.f32 1e-05, %v817_v19 }
 0x105   : > { %v1980_v34 = vld [vmem:[#allocation5 + $0x2] ss:$0 sm:$0xff] }
 0x106   : > { %1982 = vrsqrt.f32 %v820_v61  ;;  %vm827_vm0 = vweird.f32 %v820_v61  ;;  %v842_v7 = vsub.f32 %v2430_v16, %v1980_v34  ;;  %v843_v46 = vsub.f32 %v2524_v59, %v1980_v34 }
 0x107   : > { %v840_v50 = vsub.f32 %v2440_v29, %v1980_v34  ;;  %v841_v62 = vsub.f32 %v2442_v47, %v1980_v34  ;;  %v844_v33 = vsub.f32 %v2996_v9, %v1980_v34  ;;  %v845_v35 = vsub.f32 %v2515_v53, %v1980_v34 }
 0x108   : > { %v846_v47 = vsub.f32 %v2506_v31, %v1980_v34  ;;  %v847_v55 = vsub.f32 %v2476_v6, %v1980_v34 }
 0x10c   : > { %v1983_v21 = vpop.eup %1982 }
 0x10d   : > { %v822_v0 = vmul.f32 %v1983_v21, %v820_v61  ;;  %vm828_vm1 = vweird.f32 %v1983_v21 }
 0x10e   : > { %vm829_vm2 = vmor %vm827_vm0, %vm828_vm1  ;;  %vm1063_vm1 = vsmask.f32 7424 }
 0x10f   : > { %v823_v14 = vmul.f32 %v1983_v21, %v822_v0  ;;  %vm2602_vm0 = vmand %vm973_vm11, %vm874_vm4  ;;  %vm1407_vm4 = vcmask 785408  }
 0x111   : > { %v824_v30 = vmul.f32 0.5, %v823_v14 }
 0x113   : > { %v825_v26 = vsub.f32 1.5, %v824_v30 }
 0x115   : > { %v826_v63 = vmul.f32 %v1983_v21, %v825_v26  ;;  %v982_v26 = vld [vmem:[#allocation2 + $0x14] sm:$0x3] }
 0x117   : > { %v830_v49 = vsel %vm829_vm2, %v1983_v21, %v826_v63  ;;  %v968_v21 = vld [vmem:[#allocation2] sm:$0xe]  ;;  %vm1279_vm2 = vsmask.f32 5376 }
 0x118   : > { %v832_v25 = vrot.slane %v830_v49, 7 }
 0x11a   : > { %v834_v23 = vmul.f32 %v832_v25, %v2995_v56 }
 0x11c   : > { %836 = vst.msk [vmem:[#allocation5 + $0x2] sm:$0x2] %vm835_vm3, %v834_v23  ;;  %vm1165_vm3 = vsmask.f32 6400 }
 0x123   : > { %v1981_v3 = vld [vmem:[#allocation5 + $0x3] ss:$0 sm:$0xff] }
 0x124   : > { %v851_v36 = vmul.f32 %v1981_v3, %v842_v7  ;;  %v852_v16 = vmul.f32 %v1981_v3, %v843_v46  ;;  %v849_v54 = vmul.f32 %v1981_v3, %v840_v50  ;;  %v850_v59 = vmul.f32 %v1981_v3, %v841_v62  ;;  %v975_v50 = vld [vmem:[#allocation2 + $0x8] sm:$0x3] }
 0x125   : > { %v853_v13 = vmul.f32 %v1981_v3, %v844_v33  ;;  %v854_v29 = vmul.f32 %v1981_v3, %v845_v35  ;;  %v855_v58 = vmul.f32 %v1981_v3, %v846_v47  ;;  %v856_v41 = vmul.f32 %v1981_v3, %v847_v55 }
 0x126   : > { %v860_v53 = vadd.f32 %v2577_v28, %v851_v36  ;;  %v861_v39 = vadd.f32 %v2577_v28, %v852_v16  ;;  %v858_v37 = vadd.f32 %v2577_v28, %v849_v54  ;;  %v859_v27 = vadd.f32 %v2577_v28, %v850_v59 }
 0x127   : > { %v862_v40 = vadd.f32 %v2577_v28, %v853_v13  ;;  %v863_v44 = vadd.f32 %v2577_v28, %v854_v29  ;;  %v864_v60 = vadd.f32 %v2577_v28, %v855_v58  ;;  %v985_v13 = vld [vmem:[#allocation2 + $0x18] sm:$0xe] }
 0x128   : > { %v868_v2 = vpack.c.bf16 %v860_v53, %v860_v53  ;;  %v869_v57 = vpack.c.bf16 %v861_v39, %v861_v39  ;;  %v866_v31 = vpack.c.bf16 %v858_v37, %v858_v37  ;;  %v867_v51 = vpack.c.bf16 %v859_v27, %v859_v27 }
 0x129   : > { %v870_v6 = vpack.c.bf16 %v862_v40, %v862_v40  ;;  %v871_v17 = vpack.c.bf16 %v863_v44, %v863_v44  ;;  %v865_v53 = vadd.f32 %v2577_v28, %v856_v41  ;;  %v2620_v37 = vpack.c.bf16 %v864_v60, %v864_v60  ;;  %v989_v44 = vld [vmem:[#allocation2 + $0x20] sm:$0x3] }
 0x12a   : > { %v897_v4 = vshrl.u32 %v868_v2, 16  ;;  %v900_v1 = vshll.u32 %v868_v2, 16  ;;  %v906_v42 = vshrl.u32 %v869_v57, 16  ;;  %v909_v45 = vshll.u32 %v869_v57, 16 }
 0x12b   : > { %v878_v11 = vshrl.u32 %v866_v31, 16  ;;  %v881_v38 = vshll.u32 %v866_v31, 16  ;;  %v887_v43 = vshrl.u32 %v867_v51, 16  ;;  %v890_v20 = vshll.u32 %v867_v51, 16 }
 0x12c   : > { %v899_v10 = vrot.slane %v897_v4, 6  ;;  %v902_v22 = vrot.slane %v900_v1, 7  ;;  %v908_v32 = vrot.slane %v906_v42, 6  ;;  %v911_v52 = vrot.slane %v909_v45, 7 }
 0x12d   : > { %v880_v5 = vrot.slane %v878_v11, 6  ;;  %v883_v12 = vrot.slane %v881_v38, 7  ;;  %v889_v15 = vrot.slane %v887_v43, 6  ;;  %v892_v24 = vrot.slane %v890_v20, 7 }
 0x12e   : > { %v903_v19 = vor.u32 %v902_v22, %v899_v10  ;;  %v912_v61 = vor.u32 %v911_v52, %v908_v32  ;;  %v916_v0 = vshrl.u32 %v870_v6, 16  ;;  %v919_v14 = vshll.u32 %v870_v6, 16 }
 0x12f   : > { %v884_v63 = vor.u32 %v883_v12, %v880_v5  ;;  %v893_v49 = vor.u32 %v892_v24, %v889_v15  ;;  %v925_v25 = vshrl.u32 %v871_v17, 16  ;;  %v928_v23 = vshll.u32 %v871_v17, 16 }
 0x130   : > { %v904_v34 = vrot.slane %v903_v19, 4  ;;  %v914_v7 = vrot.slane %v912_v61, 4  ;;  %v979_v46 = vsel %vm2590_vm13, %v903_v19, %v978_v48  ;;  %v918_v62 = vrot.slane %v916_v0, 6 }
 0x131   : > { %980 = vst [vmem:[#allocation2 + $0xc] sm:$0xe] %v979_v46  ;;  %v885_v9 = vrot.slane %v884_v63, 4  ;;  %v895_v33 = vrot.slane %v893_v49, 4  ;;  %v969_v35 = vsel %vm2590_vm13, %v884_v63, %v968_v21  ;;  %v921_v3 = vrot.slane %v919_v14, 7 }
 0x132   : > { %v913_v36 = vsel %vm2596_vm14, %v904_v34, %v912_v61  ;;  %v983_v16 = vsel %vm2602_vm0, %v914_v7, %v982_v26  ;;  %970 = vst [vmem:[#allocation2] sm:$0xe] %v969_v35  ;;  %v927_v54 = vrot.slane %v925_v25, 6  ;;  %v930_v59 = vrot.slane %v928_v23, 7 }
 0x133   : > { %981 = vst.msk [vmem:[#allocation2 + $0x10] sm:$0xf] %vm971_vm12, %v913_v36  ;;  %v894_v29 = vsel %vm2596_vm14, %v885_v9, %v893_v49  ;;  %v976_v47 = vsel %vm2602_vm0, %v895_v33, %v975_v50  ;;  %v922_v55 = vor.u32 %v921_v3, %v918_v62  ;;  %v2627_v57 = vpack.c.bf16 %v865_v53, %v865_v53 }
 0x134   : > { %984 = vst [vmem:[#allocation2 + $0x14] sm:$0x3] %v983_v16  ;;  %v931_v39 = vor.u32 %v930_v59, %v927_v54  ;;  %v935_v28 = vshrl.u32 %v2620_v37, 16  ;;  %v938_v43 = vshll.u32 %v2620_v37, 16 }
 0x135   : > { %972 = vst.msk [vmem:[#allocation2 + $0x4] sm:$0xf] %vm971_vm12, %v894_v29  ;;  %v923_v27 = vrot.slane %v922_v55, 4  ;;  %v986_v40 = vsel %vm2590_vm13, %v922_v55, %v985_v13  ;;  %v944_v20 = vshrl.u32 %v2627_v57, 16  ;;  %v947_v48 = vshll.u32 %v2627_v57, 16 }
 0x136   : > { %977 = vst [vmem:[#allocation2 + $0x8] sm:$0x3] %v976_v47  ;;  %v933_v58 = vrot.slane %v931_v39, 4  ;;  %v2642_v52 = vrot.slane %v935_v28, 6 }
 0x137   : > { %v932_v2 = vsel %vm2596_vm14, %v923_v27, %v931_v39  ;;  %987 = vst [vmem:[#allocation2 + $0x18] sm:$0xe] %v986_v40 }
 0x138   : > { %v1028_v31 = vld [vmem:[#allocation2 + $0xc] sm:$0x8]  ;;  %988 = vst.msk [vmem:[#allocation2 + $0x1c] sm:$0xf] %vm971_vm12, %v932_v2  ;;  %v990_v51 = vsel %vm2602_vm0, %v933_v58, %v989_v44 }
 0x139   : > { %v1020_v6 = vld [vmem:[#allocation2 + $0xc] sm:$0xc]  ;;  %v1361_v17 = vunpack.c.l.b16 %v1028_v31  ;;  %v1011_v41 = vld [vmem:[#allocation2] sm:$0xe]  ;;  %991 = vst [vmem:[#allocation2 + $0x20] sm:$0x3] %v990_v51 }
 0x13a   : > { %v2633_v60 = vld [vmem:[#allocation2 + $0xc] sm:$0xe]  ;;  %v1002_v4 = vld [vmem:[#allocation2 + $0x10] sm:$0xf]  ;;  %v1247_v1 = vunpack.c.l.b16 %v1020_v6  ;;  %v1124_v11 = vunpack.c.l.b16 %v1011_v41 }
 0x13b   : > { %v1024_v42 = vld [vmem:[#allocation2 + $0x14] sm:$0x7]  ;;  %v2635_v45 = vunpack.c.l.b16 %v1002_v4  ;;  %v1125_v32 = vunpack.c.l.b16 %v2633_v60  ;;  %v940_v4 = vrot.slane %v938_v43, 7 }
 0x13c   : > { %v1008_v38 = vld [vmem:[#allocation2 + $0x14] sm:$0x1]  ;;  %v1272_v10 = vunpack.c.l.b16 %v1024_v42  ;;  %v2639_v22 = vld [vmem:[#allocation2] sm:$0xff]  }
 0x13d   : > { %v1365_v5 = vpack.c.b16 %v2635_v45, %v1361_v17  ;;  %v2647_v12 = vunpack.c.h.b16 %v2639_v22  ;;  %v1007_v15 = vld [vmem:[#allocation2 + $0x8] sm:$0x1]  ;;  %v1065_v24 = vshrl.u32 %v2639_v22, 16  ;;  %v1067_v19 = vshll.u32 %v2639_v22, 16 }
 0x13e   : > { %v1276_v61 = vpack.c.b16 %v1272_v10, %v1272_v10  ;;  %v1055_v21 = vunpack.c.l.b16 %v1007_v15  ;;  %v1013_v0 = vld [vmem:[#allocation2 + $0x18] sm:$0xe]  ;;  %v2652_v14 = vpack.c.b16 %v2635_v45, %v1247_v1  ;;  %v1056_v26 = vunpack.c.l.b16 %v1008_v38  ;;  %v1015_v60 = vld [vmem:[#allocation2 + $0x8] sm:$0x3] }
 0x13f   : > { %v1372_v63 = vrot.slane %v1365_v5, 3  ;;  %v2655_v49 = vpack.c.b16 %v2647_v12, %v1124_v11  ;;  %v2657_v25 = vld [vmem:[#allocation2 + $0x18] sm:$0xff]   ;;  %v1126_v23 = vunpack.c.l.b16 %v1013_v0  ;;  %v1069_v34 = vrot.slane %v1067_v19, 1 }
 0x140   : > { %v1373_v7 = vrot.slane %v1276_v61, 3  ;;  %v1059_v46 = vpack.c.b16 %v1055_v21, %v1055_v21  ;;  %v2660_v50 = vunpack.c.h.b16 %v2657_v25  ;;  %v1009_v62 = vld [vmem:[#allocation2 + $0x20] sm:$0x1]  ;;  %v1089_v9 = vshrl.u32 %v2657_v25, 16  ;;  %v1029_v51 = vld [vmem:[#allocation2 + $0x18] sm:$0x8] }
 0x141   : > { %v1133_v33 = vrot.slane %v2655_v49, 1  ;;  %v1057_v35 = vunpack.c.l.b16 %v1009_v62  ;;  %v1070_v3 = vor.u32 %v1069_v34, %v1065_v24  ;;  %v1091_v36 = vshll.u32 %v2657_v25, 16  ;;  %v1025_v31 = vld [vmem:[#allocation2 + $0x20] sm:$0x7] }
 0x142   : > { %v1374_v16 = vsel %vm503_vm9, %v1372_v63, %v1373_v7  ;;  %v1072_v54 = vshll.u32 %v1059_v46, 16  ;;  %v1134_v59 = vrot.slane %v1059_v46, 1  ;;  %v2667_v13 = vpack.c.b16 %v2660_v50, %v1126_v23  ;;  %v1017_v19 = vld [vmem:[#allocation2 + $0x20] sm:$0x3] }
 0x143   : > { %1383 = vrot.lane.b32.xlu0 %v1374_v16, %s2076_s18  ;;  %v1061_v29 = vpack.c.b16 %v1057_v35, %v1057_v35  ;;  %v1093_v47 = vrot.slane %v1091_v36, 1  ;;  %v1298_v55 = vshrl.u32 %v2652_v14, 16  ;;  %v1301_v53 = vshll.u32 %v2652_v14, 16  ;;  %v1023_v36 = vld [vmem:[#allocation2 + $0x8] sm:$0x7] }
 0x144   : > { %v1135_v39 = vsel %vm379_vm7, %v1133_v33, %v1134_v59  ;;  %v1139_v37 = vrot.slane %v2667_v13, 1  ;;  %v1074_v27 = vrot.slane %v1072_v54, 1  ;;  %v1306_v40 = vshrl.u32 %v1276_v61, 16 }
 0x145   : > { %1145 = vrot.lane.b32.xlu1 %v1135_v39, %s2076_s18  ;;  %v1140_v44 = vrot.slane %v1061_v29, 1  ;;  %v1094_v58 = vor.u32 %v1093_v47, %v1089_v9  ;;  %v1096_v2 = vshll.u32 %v1061_v29, 16  ;;  %v2675_v28 = vpack.c.b16 %v1056_v26, %v1056_v26  ;;  %v1027_v29 = vld [vmem:[#allocation2] sm:$0x8] }
 0x146   : > { %v1075_v6 = vsel %vm1063_vm1, %v1070_v3, %v1074_v27  ;;  %v1300_v17 = vrot.slane %v1298_v55, 2  ;;  %v1309_v41 = vshll.u32 %v1276_v61, 16  ;;  %v1303_v42 = vrot.slane %v1301_v53, 3  ;;  %v1021_v53 = vld [vmem:[#allocation2 + $0x18] sm:$0xc] }
 0x147   : > { %v1098_v1 = vrot.slane %v1096_v2, 1  ;;  %v1308_v11 = vrot.slane %v1306_v40, 2  ;;  %v2679_v38 = vpack.c.b16 %v2635_v45, %v1125_v32  ;;  %v1141_v10 = vsel %vm379_vm7, %v1139_v37, %v1140_v44 }
 0x148   : > { %v1311_v5 = vrot.slane %v1309_v41, 3  ;;  %v1273_v15 = vunpack.c.l.b16 %v1025_v31  ;;  %v1362_v24 = vunpack.c.l.b16 %v1029_v51  ;;  %v1137_v0 = vrot.slane %v2675_v28, 1 }
 0x149   : > { %v1099_v21 = vsel %vm1063_vm1, %v1094_v58, %v1098_v1  ;;  %v1157_v61 = vunpack.c.l.b16 %v1015_v60  ;;  %v1167_v43 = vshrl.u32 %v2655_v49, 16  ;;  %v1136_v32 = vrot.slane %v2679_v38, 1 }
 0x14a   : > { %1116 = vrot.lane.b32.xlu2 %v1099_v21, %s2077_s6  ;;  %v1277_v26 = vpack.c.b16 %v1273_v15, %v1273_v15  ;;  %v1366_v63 = vpack.c.b16 %v2660_v50, %v1362_v24  ;;  %v1170_v23 = vshll.u32 %v2655_v49, 16  ;;  %v1159_v46 = vunpack.c.l.b16 %v1017_v19  ;;  %v1016_v24 = vld [vmem:[#allocation2 + $0x14] sm:$0x3] }
 0x14b   : > { %1149 = vrot.lane.b32.xlu0 %v1141_v10, %s2076_s18  ;;  %v2690_v34 = vpack.c.b16 %v1157_v61, %v1157_v61  ;;  %v1169_v7 = vrot.slane %v1167_v43, 1  ;;  %v2693_v62 = vor.u32 %v940_v4, %v2642_v52  ;;  %v1304_v9 = vor.u32 %v1303_v42, %v1300_v17  ;;  %v992_v42 = vld [vmem:[#allocation2 + $0x24] sm:$0xe] }
 0x14c   : > { %v1312_v33 = vor.u32 %v1311_v5, %v1308_v11  ;;  %v1375_v35 = vrot.slane %v1366_v63, 3  ;;  %v1172_v3 = vrot.slane %v1170_v23, 2  ;;  %v1376_v16 = vrot.slane %v1277_v26, 3 }
 0x14d   : > { %1112 = vrot.lane.b32.xlu1 %v1075_v6, %s2077_s6  ;;  %v1175_v54 = vshrl.u32 %v2690_v34, 16  ;;  %v1178_v49 = vshll.u32 %v2690_v34, 16  ;;  %v2698_v59 = vpack.c.b16 %v1159_v46, %v1159_v46  ;;  %v1138_v47 = vsel %vm379_vm7, %v1136_v32, %v1137_v0 }
 0x14e   : > { %v1201_v52 = vshrl.u32 %v2667_v13, 16  ;;  %v1204_v55 = vshll.u32 %v2667_v13, 16  ;;  %v946_v39 = vrot.slane %v944_v20, 6  ;;  %v1173_v37 = vor.u32 %v1172_v3, %v1169_v7 }
 0x14f   : > { %v1177_v27 = vrot.slane %v1175_v54, 1  ;;  %v1180_v40 = vrot.slane %v1178_v49, 2  ;;  %v1209_v44 = vshrl.u32 %v2698_v59, 16  ;;  %v1313_v58 = vsel %vm1279_vm2, %v1304_v9, %v1312_v33  ;;  %v1001_v9 = vld [vmem:[#allocation2 + $0xc] sm:$0xf] }
 0x150   : > { %v1212_v2 = vshll.u32 %v2698_v59, 16  ;;  %v1271_v31 = vunpack.c.l.b16 %v1023_v36  ;;  %v1360_v51 = vunpack.c.l.b16 %v1027_v29  ;;  %v1377_v6 = vsel %vm503_vm9, %v1375_v35, %v1376_v16  ;;  %v996_v35 = vld [vmem:[#allocation2 + $0x2c] sm:$0x3] }
 0x151   : > { %v1181_v17 = vor.u32 %v1180_v40, %v1177_v27  ;;  %v1248_v41 = vunpack.c.l.b16 %v1021_v53  ;;  %v1323_v13 = vshrl.u32 %v1277_v26, 16  ;;  %v1203_v60 = vrot.slane %v1201_v52, 1 }
 0x152   : > { %v1206_v4 = vrot.slane %v1204_v55, 2  ;;  %v1211_v1 = vrot.slane %v1209_v44, 1  ;;  %v1214_v20 = vrot.slane %v1212_v2, 2  ;;  %v1326_v15 = vshll.u32 %v1277_v26, 16 }
 0x153   : > { %1350 = vrot.lane.b32.xlu0 %v1313_v58, %s2077_s6  ;;  %v1182_v11 = vsel %vm1165_vm3, %v1173_v37, %v1181_v17  ;;  %v2712_v10 = vpack.c.b16 %v2660_v50, %v1248_v41  ;;  %v1325_v5 = vrot.slane %v1323_v13, 2  ;;  %v2715_v19 = vpack.c.b16 %v1271_v31, %v1271_v31 }
 0x154   : > { %1234 = vrot.lane.b32.xlu2 %v1182_v11, %s2078_s7  ;;  %v1364_v21 = vpack.c.b16 %v2647_v12, %v1360_v51  ;;  %v942_v0 = vrot.slane %v2693_v62, 4  ;;  %v949_v61 = vrot.slane %v947_v48, 7  ;;  %v1328_v32 = vrot.slane %v1326_v15, 3  ;;  %v1902_v51 = vld [vmem:[%s2947_s2 + $0x30] sm:$0xff] }
 0x155   : > { %1147 = vrot.lane.b32.xlu1 %v1138_v47, %s2076_s18  ;;  %v1315_v50 = vshrl.u32 %v2712_v10, 16  ;;  %v1318_v43 = vshll.u32 %v2712_v10, 16  ;;  %v993_v26 = vsel %vm2590_vm13, %v2693_v62, %v992_v42  ;;  %v1207_v63 = vor.u32 %v1206_v4, %v1203_v60  ;;  %v1019_v62 = vld [vmem:[#allocation2] sm:$0xc] }
 0x156   : > { %v1215_v23 = vor.u32 %v1214_v20, %v1211_v1  ;;  %v950_v7 = vor.u32 %v949_v61, %v946_v39  ;;  %994 = vst [vmem:[#allocation2 + $0x24] sm:$0xe] %v993_v26  ;;  %v1158_v46 = vunpack.c.l.b16 %v1016_v24  ;;  %v1329_v48 = vor.u32 %v1328_v32, %v1325_v5 }
 0x157   : > { %v1317_v33 = vrot.slane %v1315_v50, 2  ;;  %v1320_v57 = vrot.slane %v1318_v43, 3  ;;  %v1184_v3 = vshrl.u32 %v2679_v38, 16  ;;  %v1187_v18 = vshll.u32 %v2679_v38, 16  ;;  %v1903_v38 = vld [vmem:[%s2947_s2 + $0x38] sm:$0xff] }
 0x158   : > { %v951_v36 = vsel %vm2596_vm14, %v942_v0, %v950_v7  ;;  %v952_v16 = vrot.slane %v950_v7, 4  ;;  %v2730_v54 = vpack.c.b16 %v1158_v46, %v1158_v46  ;;  %v1369_v49 = vrot.slane %v1364_v21, 3  ;;  %1561 = vmatpush.bf16.msra.mxu0 %v1903_v38  ;;  %1919 = vmatpush.bf16.msra.mxu2 %v1903_v38 }
 0x159   : > { %v1370_v29 = vrot.slane %v2715_v19, 3  ;;  %v1321_v47 = vor.u32 %v1320_v57, %v1317_v33  ;;  %995 = vst.msk [vmem:[#allocation2 + $0x28] sm:$0xf] %vm971_vm12, %v951_v36  ;;  %v1041_v52 = vunpack.c.l.b16 %v1001_v9  ;;  %v1216_v55 = vsel %vm1165_vm3, %v1207_v63, %v1215_v23 }
 0x15a   : > { %v997_v53 = vsel %vm2602_vm0, %v952_v16, %v996_v35  ;;  %v1192_v8 = vshrl.u32 %v2730_v54, 16  ;;  %v1195_v39 = vshll.u32 %v2730_v54, 16  ;;  %v1084_v40 = vshll.u32 %v2675_v28, 16 }
 0x15b   : > { %1385 = vrot.lane.b32.xlu0 %v1377_v6, %s2076_s18  ;;  %v1330_v37 = vsel %vm1279_vm2, %v1321_v47, %v1329_v48  ;;  %998 = vst [vmem:[#allocation2 + $0x2c] sm:$0x3] %v997_v53  ;;  %v2746_v27 = vpack.c.b16 %v2635_v45, %v1041_v52  ;;  %v1246_v30 = vunpack.c.l.b16 %v1019_v62  ;;  %v1186_v44 = vrot.slane %v1184_v3, 1 }
 0x15c   : > { %1352 = vrot.lane.b32.xlu2 %v1330_v37, %s2077_s6  ;;  %v1189_v58 = vrot.slane %v1187_v18, 2  ;;  %v1194_v2 = vrot.slane %v1192_v8, 1  ;;  %v1197_v31 = vrot.slane %v1195_v39, 2  ;;  %v1289_v41 = vshrl.u32 %v2715_v19, 16  ;;  %1562 = vmatpush.bf16.msra.mxu0 %v1902_v51 }
 0x15d   : > { %1238 = vrot.lane.b32.xlu1 %v1216_v55, %s2078_s7  ;;  %v1014_v6 = vld [vmem:[#allocation2 + $0x24] sm:$0xe]  ;;  %v1077_v45 = vshrl.u32 %v2746_v27, 16  ;;  %v1079_v17 = vshll.u32 %v2746_v27, 16  ;;  %v2757_v28 = vpack.c.b16 %v2647_v12, %v1246_v30  ;;  %v1086_v1 = vrot.slane %v1084_v40, 1  ;;  %v1901_v12 = vld [vmem:[%s2947_s2 + $0x28] sm:$0xff]  ;;  %1920 = vmatpush.bf16.msra.mxu2 %v1902_v51 }
 0x15e   : > { %v1022_v13 = vld [vmem:[#allocation2 + $0x24] sm:$0xc]  ;;  %v1127_v60 = vunpack.c.l.b16 %v1014_v6  ;;  %v1292_v20 = vshll.u32 %v2715_v19, 16  ;;  %v1371_v42 = vsel %vm503_vm9, %v1369_v49, %v1370_v29  ;;  %v1190_v5 = vor.u32 %v1189_v58, %v1186_v44 }
 0x15f   : > { %v1081_v4 = vrot.slane %v1079_v17, 1  ;;  %v1198_v15 = vor.u32 %v1197_v31, %v1194_v2  ;;  %v1249_v24 = vunpack.c.l.b16 %v1022_v13  ;;  %v1281_v61 = vshrl.u32 %v2757_v28, 16  ;;  %v1030_v49 = vld [vmem:[#allocation2 + $0x24] sm:$0x8] }
 0x160   : > { %v2762_v11 = vld [vmem:[#allocation2 + $0x24] sm:$0xff]   ;;  %v1284_v19 = vshll.u32 %v2757_v28, 16  ;;  %v1291_v43 = vrot.slane %v1289_v41, 2  ;;  %v1294_v7 = vrot.slane %v1292_v20, 3  ;;  %1563 = vmatpush.bf16.msra.mxu0 %v1901_v12  ;;  %v1363_v30 = vunpack.c.l.b16 %v1030_v49 }
 0x161   : > { %v2768_v21 = vunpack.c.h.b16 %v2762_v11  ;;  %v1082_v0 = vor.u32 %v1081_v4, %v1077_v45  ;;  %v1199_v9 = vsel %vm1165_vm3, %v1190_v5, %v1198_v15  ;;  %v1283_v3 = vrot.slane %v1281_v61, 2  ;;  %1921 = vmatpush.bf16.msra.mxu2 %v1901_v12 }
 0x162   : > { %v1010_v50 = vld [vmem:[#allocation2 + $0x2c] sm:$0x1]  ;;  %v1286_v36 = vrot.slane %v1284_v19, 3  ;;  %v1101_v52 = vshrl.u32 %v2762_v11, 16  ;;  %v1103_v55 = vshll.u32 %v2762_v11, 16  ;;  %v1295_v2 = vor.u32 %v1294_v7, %v1291_v43 }
 0x163   : > { %v1026_v32 = vld [vmem:[#allocation2 + $0x2c] sm:$0x7]  ;;  %1381 = vrot.lane.b32.xlu0 %v1371_v42, %s2076_s18  ;;  %v1058_v26 = vunpack.c.l.b16 %v1010_v50  ;;  %v1131_v63 = vpack.c.b16 %v2768_v21, %v1127_v60  ;;  %v1087_v23 = vsel %vm1063_vm1, %v1082_v0, %v1086_v1  ;;  %v2778_v33 = vpack.c.b16 %v2768_v21, %v1249_v24 }
 0x164   : > { %v1018_v46 = vld [vmem:[#allocation2 + $0x2c] sm:$0x3]  ;;  %1114 = vrot.lane.b32.xlu2 %v1087_v23, %s2077_s6  ;;  %v1274_v57 = vunpack.c.l.b16 %v1026_v32  ;;  %v1105_v44 = vrot.slane %v1103_v55, 1  ;;  %v1287_v45 = vor.u32 %v1286_v36, %v1283_v3  ;;  %v1367_v61 = vpack.c.b16 %v2768_v21, %v1363_v30  ;;  %v1900_v21 = vld [vmem:[%s2947_s2 + $0x20] sm:$0xff]  ;;  %v1906_v3 = vld [vmem:[%s2947_s2 + $0x50] sm:$0xff] }
 0x165   : > { %v1062_v48 = vpack.c.b16 %v1058_v26, %v1058_v26  ;;  %v1142_v35 = vrot.slane %v1131_v63, 1  ;;  %v1332_v18 = vshrl.u32 %v2778_v33, 16  ;;  %v1335_v62 = vshll.u32 %v2778_v33, 16  ;;  %v1909_v7 = vld [vmem:[%s2947_s2 + $0x68] sm:$0xff]  ;;  %1564 = vmatpush.bf16.msra.mxu0 %v1900_v21  ;;  %1922 = vmatpush.bf16.msra.mxu2 %v1900_v21  ;;  %v1896_v36 = vld [vmem:[%s2947_s2] sm:$0xff] }
 0x166   : > { %v1278_v16 = vpack.c.b16 %v1274_v57, %v1274_v57  ;;  %v1160_v29 = vunpack.c.l.b16 %v1018_v46  ;;  %v1106_v17 = vor.u32 %v1105_v44, %v1101_v52  ;;  %v1218_v41 = vshrl.u32 %v1131_v63, 16  ;;  %1927 = vmatpush.bf16.msra.mxu3 %v1909_v7  ;;  %v1899_v46 = vld [vmem:[%s2947_s2 + $0x18] sm:$0xff]  ;;  %1592 = vmatpush.bf16.msra.mxu1 %v1909_v7  ;;  %v1898_v57 = vld [vmem:[%s2947_s2 + $0x10] sm:$0xff] }
 0x167   : > { %v1143_v47 = vrot.slane %v1062_v48, 1  ;;  %v1108_v53 = vshll.u32 %v1062_v48, 16  ;;  %v1334_v8 = vrot.slane %v1332_v18, 2  ;;  %v1337_v39 = vrot.slane %v1335_v62, 3  ;;  %v1907_v48 = vld [vmem:[%s2947_s2 + $0x58] sm:$0xff]  ;;  %v1904_v18 = vld [vmem:[%s2947_s2 + $0x40] sm:$0xff] }
 0x168   : > { %v1340_v38 = vshrl.u32 %v1278_v16, 16  ;;  %v1343_v37 = vshll.u32 %v1278_v16, 16  ;;  %v2786_v6 = vpack.c.b16 %v1160_v29, %v1160_v29  ;;  %v1221_v13 = vshll.u32 %v1131_v63, 16 }
 0x169   : > { %v1144_v40 = vsel %vm379_vm7, %v1142_v35, %v1143_v47  ;;  %v1110_v58 = vrot.slane %v1108_v53, 1  ;;  %v1338_v60 = vor.u32 %v1337_v39, %v1334_v8  ;;  %v1220_v5 = vrot.slane %v1218_v41, 1  ;;  %1565 = vmatpush.bf16.msra.mxu0 %v1899_v46  ;;  %1923 = vmatpush.bf16.msra.mxu2 %v1899_v46  ;;  %v1897_v35 = vld [vmem:[%s2947_s2 + $0x8] sm:$0xff] }
 0x16a   : > { %1151 = vrot.lane.b32.xlu1 %v1144_v40, %s2076_s18  ;;  %v1342_v31 = vrot.slane %v1340_v38, 2  ;;  %v1345_v51 = vrot.slane %v1343_v37, 3  ;;  %v1226_v1 = vshrl.u32 %v2786_v6, 16  ;;  %v1229_v20 = vshll.u32 %v2786_v6, 16 }
 0x16b   : > { %1236 = vrot.lane.b32.xlu0 %v1199_v9, %s2078_s7  ;;  %v1111_v42 = vsel %vm1063_vm1, %v1106_v17, %v1110_v58  ;;  %v1223_v15 = vrot.slane %v1221_v13, 2  ;;  %v1296_v0 = vsel %vm1279_vm2, %v1287_v45, %v1295_v2  ;;  %v1378_v32 = vrot.slane %v1367_v61, 3  ;;  %v1908_v9 = vld [vmem:[%s2947_s2 + $0x60] sm:$0xff] }
 0x16c   : > { %v1346_v4 = vor.u32 %v1345_v51, %v1342_v31  ;;  %1118 = vrot.lane.b32.xlu2 %v1111_v42, %s2077_s6  ;;  %v1228_v24 = vrot.slane %v1226_v1, 1  ;;  %v1231_v12 = vrot.slane %v1229_v20, 2  ;;  %v1379_v26 = vrot.slane %v1278_v16, 3  ;;  %1928 = vmatpush.bf16.msra.mxu3 %v1908_v9  ;;  %v1905_v16 = vld [vmem:[%s2947_s2 + $0x48] sm:$0xff] }
 0x16d   : > { %v1224_v19 = vor.u32 %v1223_v15, %v1220_v5  ;;  %1593 = vmatpush.bf16.msra.mxu1 %v1908_v9  ;;  %1566 = vmatpush.bf16.msra.mxu0 %v1898_v57  ;;  %vm1389_vm7 = vcmask 261120   ;;  %v1259_v53 = vrot.slane %v2730_v54, 2  ;;  %v1258_v8 = vrot.slane %v2652_v14, 2 }
 0x16e   : > { %v1347_v50 = vsel %vm1279_vm2, %v1338_v60, %v1346_v4  ;;  %v1232_v43 = vor.u32 %v1231_v12, %v1228_v24  ;;  %v1380_v23 = vsel %vm503_vm9, %v1378_v32, %v1379_v26  ;;  %1924 = vmatpush.bf16.msra.mxu2 %v1898_v57  ;;  %vm1398_vm9 = vcmask 523264  }
 0x16f   : > { %v1260_v30 = vsel %vm441_vm8, %v1258_v8, %v1259_v53  ;;  %v1261_v54 = vrot.slane %v2712_v10, 2  ;;  %v1262_v51 = vrot.slane %v2698_v59, 2  ;;  %v1256_v61 = vrot.slane %v2690_v34, 2 }
 0x170   : > { %v1233_v63 = vsel %vm1165_vm3, %v1224_v19, %v1232_v43  ;;  %1929 = vmatpush.bf16.msra.mxu3 %v1907_v48  ;;  %v1265_v43 = vrot.slane %v2786_v6, 2 }
 0x171   : > { %1594 = vmatpush.bf16.msra.mxu1 %v1907_v48  ;;  %1567 = vmatpush.bf16.msra.mxu0 %v1897_v35  ;;  %v1263_v60 = vsel %vm441_vm8, %v1261_v54, %v1262_v51  ;;  %v2079_v54 = vmov 16.0  }
 0x172   : > { %1348 = vrot.lane.b32.xlu1 %v1296_v0, %s2077_s6  ;;  %1925 = vmatpush.bf16.msra.mxu2 %v1897_v35  ;;  %v1255_v0 = vrot.slane %v2757_v28, 2  ;;  %1984 = vrcp.f32 %v2079_v54 }
 0x173   : > { %1354 = vrot.lane.b32.xlu0 %v1347_v50, %s2077_s6 }
 0x174   : > { %1240 = vrot.lane.b32.xlu2 %v1233_v63, %s2078_s7  ;;  %1930 = vmatpush.bf16.msra.mxu3 %v1906_v3 }
 0x175   : > { %1595 = vmatpush.bf16.msra.mxu1 %v1906_v3  ;;  %1568 = vmatpush.bf16.msra.mxu0 %v1896_v36  ;;  %v2876_v3 = vperm.slane %v2995_v56, 3 }
 0x176   : > { %1926 = vmatpush.bf16.msra.mxu2 %v1896_v36 }
 0x178   : > { %1931 = vmatpush.bf16.msra.mxu3 %v1905_v16 }
 0x179   : > { %1596 = vmatpush.bf16.msra.mxu1 %v1905_v16 }
 0x17a   : > { %1387 = vrot.lane.b32.xlu1 %v1380_v23, %s2076_s18 }
 0x17c   : > { %1932 = vmatpush.bf16.msra.mxu3 %v1904_v18 }
 0x17d   : > { %1597 = vmatpush.bf16.msra.mxu1 %v1904_v18 }
 0x1a4   : > { %v1117_v62 = vpop.permute.xlu2 %1116 }
 0x1ae   : > { %v1235_v29 = vpop.permute.xlu2 %1234 }
 0x1b5   : > { %v1384_v49 = vpop.permute.xlu0 %1383 }
 0x1b6   : > { %v1353_v38 = vpop.permute.xlu2 %1352 }
 0x1b7   : > { %v1146_v47 = vpop.permute.xlu1 %1145  ;;  %v1428_v1 = vsel %vm1389_vm7, %v1263_v60, %v1353_v38 }
 0x1bd   : > { %v1150_v52 = vpop.permute.xlu0 %1149 }
 0x1be   : > { %v1115_v14 = vpop.permute.xlu2 %1114 }
 0x1bf   : > { %v1113_v55 = vpop.permute.xlu1 %1112 }
 0x1c0   : > { %v1391_v39 = vsel %vm1389_vm7, %v2639_v22, %v1113_v55  ;;  %v1395_v22 = vsel %vm1389_vm7, %v2657_v25, %v1117_v62  ;;  %v1393_v25 = vsel %vm1389_vm7, %v2746_v27, %v1115_v14  ;;  %v1257_v27 = vsel %vm441_vm8, %v1255_v0, %v1256_v61 }
 0x1c1   : > { %v1400_v37 = vsel %vm1398_vm9, %v1391_v39, %v1146_v47  ;;  %v1404_v17 = vsel %vm1398_vm9, %v1395_v22, %v1150_v52 }
 0x1c2   : > { %v1409_v40 = vsel %vm1407_vm4, %v1400_v37, %v1235_v29 }
 0x1c3   : > { %1569 = vmatmul.bf16.vlgmr.msra.gmra.mxu0 %v1409_v40 }
 0x1c5   : > { %v1351_v44 = vpop.permute.xlu0 %1350 }
 0x1c6   : > { %v1425_v58 = vsel %vm1389_vm7, %v1260_v30, %v1351_v44  ;;  %v1119_v4 = vpop.permute.xlu2 %1118 }
 0x1c7   : > { %v1148_v2 = vpop.permute.xlu1 %1147  ;;  %v1435_v31 = vsel %vm1398_vm9, %v1425_v58, %v1384_v49  ;;  %v1397_v59 = vsel %vm1389_vm7, %v2762_v11, %v1119_v4  ;;  %v1264_v11 = vrot.slane %v2778_v33, 2 }
 0x1c8   : > { %1886 = vmatmul.msk.bf16.vlgmr.msra.gmra.mxu3 %vm1407_vm4, %v1435_v31  ;;  %v1402_v5 = vsel %vm1398_vm9, %v1393_v25, %v1148_v2 }
 0x1c9   : > { %v1266_v34 = vsel %vm441_vm8, %v1264_v11, %v1265_v43 }
 0x1cd   : > { %v1386_v45 = vpop.permute.xlu0 %1385 }
 0x1ce   : > { %v1437_v42 = vsel %vm1398_vm9, %v1428_v1, %v1386_v45  ;;  %v1241_v24 = vpop.permute.xlu2 %1240 }
 0x1cf   : > { %v1239_v41 = vpop.permute.xlu1 %1238 }
 0x1d0   : > { %v1415_v13 = vsel %vm1407_vm4, %v1404_v17, %v1239_v41 }
 0x1d1   : > { %1579 = vmatmul.bf16.vlgmr.msra.gmra.mxu2 %v1415_v13 }
 0x1d5   : > { %v1382_v20 = vpop.permute.xlu0 %1381 }
 0x1d8   : > { %1887 = vmatmul.msk.bf16.gmra.mxu3 %vm1407_vm4, %v1437_v42 }
 0x1dc   : > { %v1152_v10 = vpop.permute.xlu1 %1151 }
 0x1dd   : > { %v1406_v15 = vsel %vm1398_vm9, %v1397_v59, %v1152_v10  ;;  %v1237_v12 = vpop.permute.xlu0 %1236 }
 0x1de   : > { %v1412_v19 = vsel %vm1407_vm4, %v1402_v5, %v1237_v12  ;;  %v1418_v50 = vsel %vm1407_vm4, %v1406_v15, %v1241_v24  ;;  %v2891_v12 = vpop.eup %1984 }
 0x1df   : > { %1574 = vmatmul.bf16.gmra.mxu0 %v1412_v19  ;;  %vm1716_vm8 = vweird.f32 %v2891_v12 }
 0x1e1   : > { %1584 = vmatmul.bf16.gmra.mxu2 %v1418_v50 }
 0x1e4   : > { %v1349_v32 = vpop.permute.xlu1 %1348 }
 0x1e5   : > { %v1422_v26 = vsel %vm1389_vm7, %v1257_v27, %v1349_v32  ;;  %v1355_v28 = vpop.permute.xlu0 %1354 }
 0x1e6   : > { %v1433_v63 = vsel %vm1398_vm9, %v1422_v26, %v1382_v20  ;;  %v1431_v23 = vsel %vm1389_vm7, %v1266_v34, %v1355_v28  ;;  %v1712_v28 = vmul.f32 16.0, %v2891_v12 }
 0x1e7   : > { %1885 = vmatmul.msk.bf16.vlgmr.msra.gmra.mxu1 %vm1407_vm4, %v1433_v63 }
 0x1ec   : > { %v1388_v21 = vpop.permute.xlu1 %1387 }
 0x1ed   : > { %v1439_v7 = vsel %vm1398_vm9, %v1431_v23, %v1388_v21 }
 0x1ee   : > { %1888 = vmatmul.msk.bf16.gmra.mxu3 %vm1407_vm4, %v1439_v7 }
 0x240   : > { %v1570_v33 = vpop.f32.mrf.mxu0 }
 0x241   : > { %v1571_v55 = vadd.f32 %v1570_v33, %v2876_v3 }
 0x248   : > { %v1572_v9 = vpop.f32.mrf.mxu0 }
 0x249   : > { %v1573_v58 = vadd.f32 %v1572_v9, %v2876_v3 }
 0x24b   : > { %v1604_v46 = vpop.f32.mrf.mxu3 }
 0x253   : > { %v1606_v6 = vpop.f32.mrf.mxu3 }
 0x254   : > { %v1580_v57 = vpop.f32.mrf.mxu2 }
 0x255   : > { %v1581_v49 = vadd.f32 %v1580_v57, %v2876_v3 }
 0x25b   : > { %v1609_v48 = vpop.f32.mrf.mxu3 }
 0x25c   : > { %v1575_v35 = vpop.f32.mrf.mxu0  ;;  %v1582_v36 = vpop.f32.mrf.mxu2  ;;  %v1610_v8 = vadd.f32 %v1609_v48, %v1581_v49  ;;  %v1713_v49 = vsub.f32 1.0, %v1712_v28  ;;  %v1627_v28 = vld [vmem:[#allocation5 + $0x4] sm:$0x1] }
 0x25d   : > { %v1576_v16 = vadd.f32 %v1575_v35, %v2876_v3  ;;  %v1583_v18 = vadd.f32 %v1582_v36, %v2876_v3 }
 0x25e   : > { %v1623_v30 = vmax.f32 %v1610_v8, 0.0 }
 0x25f   : > { %v1605_v29 = vadd.f32 %v1604_v46, %v1576_v16 }
 0x260   : > { %v1635_v13 = vsel %vm1389_vm7, %v1623_v30, 0.0  ;;  %v1657_v63 = vmul.f32 %v1623_v30, %v1623_v30 }
 0x261   : > { %v1621_v56 = vmax.f32 %v1605_v29, 0.0 }
 0x263   : > { %v1611_v62 = vpop.f32.mrf.mxu3  ;;  %v1631_v14 = vsel %vm1389_vm7, %v1621_v56, 0.0  ;;  %v1655_v42 = vmul.f32 %v1621_v56, %v1621_v56 }
 0x264   : > { %v1599_v47 = vpop.f32.mrf.mxu1  ;;  %v1612_v52 = vadd.f32 %v1611_v62, %v1583_v18  ;;  %v1577_v53 = vpop.f32.mrf.mxu0  ;;  %v1668_v62 = vsel %vm1389_vm7, %v1657_v63, 0.0 }
 0x265   : > { %v1578_v39 = vadd.f32 %v1577_v53, %v2876_v3  ;;  %v1600_v38 = vadd.f32 %v1599_v47, %v1571_v55  ;;  %v1585_v31 = vpop.f32.mrf.mxu2  ;;  %v1664_v34 = vsel %vm1389_vm7, %v1655_v42, 0.0 }
 0x266   : > { %v1624_v37 = vmax.f32 %v1612_v52, 0.0  ;;  %v1586_v25 = vadd.f32 %v1585_v31, %v2876_v3 }
 0x267   : > { %v1607_v40 = vadd.f32 %v1606_v6, %v1578_v39  ;;  %v1619_v2 = vmax.f32 %v1600_v38, 0.0 }
 0x268   : > { %v1637_v22 = vsel %vm1389_vm7, %v1624_v37, 0.0  ;;  %v1658_v9 = vmul.f32 %v1624_v37, %v1624_v37 }
 0x269   : > { %v1622_v44 = vmax.f32 %v1607_v40, 0.0  ;;  %v1653_v60 = vmul.f32 %v1619_v2, %v1619_v2  ;;  %v1697_v4 = vadd.f32 %v1637_v22, %v1635_v13  ;;  %v1628_v59 = vsel %vm1389_vm7, %v1619_v2, 0.0 }
 0x26a   : > { %v1670_v39 = vsel %vm1389_vm7, %v1658_v9, 0.0 }
 0x26b   : > { %v1633_v51 = vsel %vm1389_vm7, %v1622_v44, 0.0  ;;  %v1661_v19 = vsel %vm1389_vm7, %v1653_v60, 0.0  ;;  %v1698_v50 = vrot.slane %v1697_v4, 4  ;;  %v1656_v27 = vmul.f32 %v1622_v44, %v1622_v44 }
 0x26c   : > { %v1601_v45 = vpop.f32.mrf.mxu1  ;;  %v1690_v17 = vadd.f32 %v1633_v51, %v1631_v14 }
 0x26d   : > { %v1602_v41 = vadd.f32 %v1601_v45, %v1573_v58  ;;  %v1587_v21 = vpop.f32.mrf.mxu2  ;;  %v1699_v57 = vadd.f32 %v1698_v50, %v1697_v4  ;;  %v1666_v48 = vsel %vm1389_vm7, %v1656_v27, 0.0 }
 0x26e   : > { %v1691_v1 = vrot.slane %v1690_v17, 4  ;;  %v1588_v16 = vadd.f32 %v1587_v21, %v2876_v3  ;;  %v1714_v3 = vmul.f32 %v2891_v12, %v1713_v49 }
 0x26f   : > { %v1620_v20 = vmax.f32 %v1602_v41, 0.0  ;;  %v1700_v56 = vrot.slane %v1699_v57, 2 }
 0x270   : > { %v1692_v10 = vadd.f32 %v1691_v1, %v1690_v17 }
 0x271   : > { %v1629_v5 = vsel %vm1389_vm7, %v1620_v20, 0.0  ;;  %v1654_v15 = vmul.f32 %v1620_v20, %v1620_v20  ;;  %v1614_v24 = vpop.f32.mrf.mxu3  ;;  %v1701_v17 = vadd.f32 %v1700_v56, %v1699_v57 }
 0x272   : > { %v1630_v0 = vadd.f32 %v1629_v5, %v1628_v59  ;;  %v1615_v61 = vadd.f32 %v1614_v24, %v1586_v25  ;;  %v1693_v23 = vrot.slane %v1692_v10, 2 }
 0x273   : > { %v1662_v11 = vsel %vm1389_vm7, %v1654_v15, 0.0  ;;  %v1702_v5 = vrot.slane %v1701_v17, 1 }
 0x274   : > { %v1632_v43 = vadd.f32 %v1631_v14, %v1630_v0  ;;  %v1663_v32 = vadd.f32 %v1662_v11, %v1661_v19  ;;  %v1684_v26 = vrot.slane %v1630_v0, 4  ;;  %v1625_v46 = vmax.f32 %v1615_v61, 0.0 }
 0x275   : > { %v1694_v29 = vadd.f32 %v1693_v23, %v1692_v10 }
 0x276   : > { %v1665_v7 = vadd.f32 %v1664_v34, %v1663_v32  ;;  %v1685_v33 = vadd.f32 %v1684_v26, %v1630_v0  ;;  %v1634_v6 = vadd.f32 %v1633_v51, %v1632_v43  ;;  %v1659_v55 = vmul.f32 %v1625_v46, %v1625_v46 }
 0x277   : > { %v1639_v37 = vsel %vm1389_vm7, %v1625_v46, 0.0  ;;  %v1695_v58 = vrot.slane %v1694_v29, 1  ;;  %v1703_v32 = vadd.f32 %v1702_v5, %v1701_v17  ;;  %v1652_v46 = vld [vmem:[#allocation5 + $0x5] sm:$0x1] }
 0x278   : > { %v1667_v35 = vadd.f32 %v1666_v48, %v1665_v7  ;;  %v1686_v36 = vrot.slane %v1685_v33, 2  ;;  %v1636_v18 = vadd.f32 %v1635_v13, %v1634_v6  ;;  %v1672_v2 = vsel %vm1389_vm7, %v1659_v55, 0.0 }
 0x279   : > { %v1616_v47 = vpop.f32.mrf.mxu3  ;;  %v1715_v13 = vadd.f32 %v2891_v12, %v1714_v3  ;;  %v1696_v20 = vadd.f32 %v1695_v58, %v1694_v29 }
 0x27a   : > { %v1638_v52 = vadd.f32 %v1637_v22, %v1636_v18  ;;  %v1669_v53 = vadd.f32 %v1668_v62, %v1667_v35  ;;  %v1617_v8 = vadd.f32 %v1616_v47, %v1588_v16  ;;  %v1687_v38 = vadd.f32 %v1686_v36, %v1685_v33 }
 0x27b   : > { %v1717_v15 = vsel %vm1716_vm8, %v2891_v12, %v1715_v13 }
 0x27c   : > { %v1671_v40 = vadd.f32 %v1670_v39, %v1669_v53  ;;  %v1626_v30 = vmax.f32 %v1617_v8, 0.0  ;;  %v1640_v44 = vadd.f32 %v1639_v37, %v1638_v52  ;;  %v1688_v22 = vrot.slane %v1687_v38, 1 }
 0x27d   : > { %v1719_v19 = vmul.f32 %v1717_v15, %v1696_v20  ;;  %v1720_v12 = vmul.f32 %v1717_v15, %v1703_v32 }
 0x27e   : > { %v1641_v31 = vsel %vm1389_vm7, %v1626_v30, 0.0  ;;  %v1660_v14 = vmul.f32 %v1626_v30, %v1626_v30  ;;  %v1673_v54 = vadd.f32 %v1672_v2, %v1671_v40  ;;  %v1689_v42 = vadd.f32 %v1688_v22, %v1687_v38 }
 0x27f   : > { %v1642_v51 = vadd.f32 %v1641_v31, %v1640_v44  ;;  %v1704_v45 = vadd.f32 %v1641_v31, %v1639_v37 }
 0x280   : > { %v1674_v41 = vsel %vm1389_vm7, %v1660_v14, 0.0  ;;  %v1718_v50 = vmul.f32 %v1717_v15, %v1689_v42 }
 0x281   : > { %v1643_v60 = vrot.slane %v1642_v51, 4  ;;  %v1675_v4 = vadd.f32 %v1674_v41, %v1673_v54  ;;  %v1705_v1 = vrot.slane %v1704_v45, 4 }
 0x282   : > { %v1727_v23 = vsel %vm1726_vm5, %v1719_v19, %v1718_v50 }
 0x283   : > { %v1644_v25 = vadd.f32 %v1643_v60, %v1642_v51  ;;  %v1676_v59 = vrot.slane %v1675_v4, 4  ;;  %v1706_v10 = vadd.f32 %v1705_v1, %v1704_v45  ;;  %v1729_v48 = vsel %vm1728_vm6, %v1720_v12, %v1727_v23 }
 0x285   : > { %v1645_v24 = vrot.slane %v1644_v25, 2  ;;  %v1677_v0 = vadd.f32 %v1676_v59, %v1675_v4  ;;  %v1707_v61 = vrot.slane %v1706_v10, 2 }
 0x287   : > { %v1646_v27 = vadd.f32 %v1645_v24, %v1644_v25  ;;  %v1678_v11 = vrot.slane %v1677_v0, 2  ;;  %v1708_v43 = vadd.f32 %v1707_v61, %v1706_v10 }
 0x289   : > { %v1647_v26 = vrot.slane %v1646_v27, 1  ;;  %v1679_v63 = vadd.f32 %v1678_v11, %v1677_v0  ;;  %v1709_v34 = vrot.slane %v1708_v43, 1 }
 0x28b   : > { %v1648_v21 = vadd.f32 %v1647_v26, %v1646_v27  ;;  %v1680_v7 = vrot.slane %v1679_v63, 1  ;;  %v1710_v33 = vadd.f32 %v1709_v34, %v1708_v43 }
 0x28d   : > { %v1649_v6 = vadd.f32 %v1648_v21, %v1627_v28  ;;  %v1681_v9 = vadd.f32 %v1680_v7, %v1679_v63  ;;  %v1721_v57 = vmul.f32 %v1717_v15, %v1710_v33 }
 0x28f   : > { %1651 = vst.msk [vmem:[#allocation5 + $0x4] sm:$0x1] %vm818_vm15, %v1649_v6  ;;  %v1682_v35 = vadd.f32 %v1681_v9, %v1652_v46  ;;  %v1731_v36 = vsel %vm1730_vm10, %v1721_v57, %v1729_v48 }
 0x290   : > { %1733 = vst.msk [vmem:[#allocation3] sm:$0xf] %vm971_vm12, %v1731_v36 }
 0x291   : > { %1683 = vst.msk [vmem:[#allocation5 + $0x5] sm:$0x1] %vm818_vm15, %v1682_v35 }
 0x292 PF: > { %p2914_p7 = scmp.eq.s32.totalorder %s1822_s21, 1  ;;  %s1744_s23 = sshll.u32 %s2949_s4, 4  ;;  %s1745_s23 = int_to_ptr.hbm [resolvable:$true] %s1744_s23 }
 0x293   : > { %s2080_s24 = smov [#allocation3]   ;;  %s2081_s26 = smov [#allocation5]  }
 0x294   : > { %s1742_s25 = sshll.u32 %s2080_s24, 4  ;;  %s1754_s27 = sshll.u32 %s2081_s26, 4  ;;  %s1743_s25 = int_to_ptr.vmem [resolvable:$true] %s1742_s25  ;;  %s1755_s27 = int_to_ptr.vmem [resolvable:$true] %s1754_s27 }
 0x295   : > { %1934 = dma.vmem_to_hbm [thread:$0]  (%p2914_p7), %s1743_s25, 64, %s1745_s23, [#allocation4]  }
 0x296   : > { %s1756_s29 = sshll.u32 %s2950_s5, 4  ;;  %s1757_s29 = int_to_ptr.hbm [resolvable:$true] %s1756_s29 }
 0x297   : > { %1936 = dma.vmem_to_hbm [thread:$0]  (%p2914_p7), %s1755_s27, 128, %s1757_s29, [#allocation6]  }
 0x298   : > { %2055 = dma.done.wait (%p2914_p7), [#allocation4], 64  }
 0x299   : > { %2057 = vsyncadd (%p2914_p7), [#allocation4], 4294967232 }
 0x29a   : > { %2059 = dma.done.wait (%p2914_p7), [#allocation6], 128  }
 0x29b   : > { %2061 = vsyncadd (%p2914_p7), [#allocation6], 4294967168 }
 0x29c PF: > { %s18_s20 = sadd.s32 1, %s2072_s20   ;;  %s3004_s18 = smov %s2068_s19 }
 0x29d   : > { %p15_p8 = scmp.ge.s32.totalorder %s18_s20, 4   ;;  %s3005_s19 = smov %s3007_s22 }
 0x29f   :  { %17 = sbr.rel (!%p15_p8) target bundleno = 3 (0x3), region = 88 }
 0x2a4   :  { %1775 = vsyncpa [#allocation4], 1 }
 0x2a5   :  { %1777 = vsyncpa [#allocation4 + $0x1], 1 }
 0x2a6   :  { %1778 = vsyncpa [#allocation6], 1 }

</bundles_post_ra>
